<compile_context>
chip_gen: v7x
topology: tpu7x:2x2x1
jax: 0.10.0
libtpu: 0.0.40
codegen_flags: <defaults>
</compile_context>

<pallas_src>
import jax
import jax.numpy as jnp
from jax.experimental import pallas as pl
from jax.experimental.pallas import tpu as pltpu


def encoder_kernel(x_ref,
                   w1_ref, b1_ref,
                   w2_ref, b2_ref,
                   w3_ref, b3_ref,
                   w4_ref, b4_ref,
                   o_ref):
    """One grid step == TB batch elements.

    x_ref : (TB, N, 3)   points for this batch tile (channels-last, f32)
    w1    : (3, 64)  f32 ; w2/w3/w4 : (Cin, Cout) bf16   (folded conv+BN weights)
    bK    : (1, Cout) f32                                (folded conv+BN biases)
    o_ref : (TB, 128)    max-pooled features for this batch tile
    """
    TB, N, _ = x_ref.shape
    c_out = o_ref.shape[-1]

    # Fuse the batch tile into the matmul M dimension: (TB, N, 3) -> (TB*N, 3).
    x = x_ref[...].reshape(TB * N, 3)                                 # f32

    # ---- layer 1 (K=3): VPU broadcast-FMA, keeps the MXU free ----
    w1 = w1_ref[...]                                                  # (3, 64) f32
    h1 = (x[:, 0:1] * w1[0:1, :]
          + x[:, 1:2] * w1[1:2, :]
          + x[:, 2:3] * w1[2:3, :]
          + b1_ref[...])
    h1 = jnp.maximum(h1, 0.0)                                         # (M, 64) f32

    # ---- layers 2..4: bf16 MXU matmuls, f32 accumulation, f32 epilogue ----
    h2 = jnp.dot(h1.astype(jnp.bfloat16), w2_ref[...],
                 preferred_element_type=jnp.float32)
    h2 = jnp.maximum(h2 + b2_ref[...], 0.0)                           # (M, 128)

    h3 = jnp.dot(h2.astype(jnp.bfloat16), w3_ref[...],
                 preferred_element_type=jnp.float32)
    h3 = jnp.maximum(h3 + b3_ref[...], 0.0)                           # (M, 256)

    h4 = jnp.dot(h3.astype(jnp.bfloat16), w4_ref[...],
                 preferred_element_type=jnp.float32)
    h4 = h4 + b4_ref[...]                                             # (M, 128), no ReLU

    # AdaptiveMaxPool1d(1): per-batch-element max over the point axis.
    o_ref[...] = jnp.max(h4.reshape(TB, N, c_out), axis=1)            # (TB, 128)


def _const_spec(shape):
    # Small parameter, fully resident in VMEM, same block for every grid step.
    return pl.BlockSpec(shape, lambda b: tuple(0 for _ in shape))


@jax.jit
def encoder_forward(x_ncw, params):
    """x_ncw: (B, 3, N) float32, PyTorch NCW layout. Returns (B, 128) float32."""
    B, cin, N = x_ncw.shape
    assert cin == 3
    x_nlc = jnp.transpose(x_ncw, (0, 2, 1))                           # (B, N, 3)

    (w1, b1), (w2, b2), (w3, b3), (w4, b4) = params
    c_out = w4.shape[-1]

    # Batch tiling: fully fuse small batches (single grid step); keep two grid
    # steps for larger even batches so v7x's two TensorCores both get work.
    num_steps = 2 if (B >= 4 and B % 2 == 0) else 1
    TB = B // num_steps

    in_specs = [
        pl.BlockSpec((TB, N, 3), lambda b: (b, 0, 0)),
        _const_spec(w1.shape), _const_spec(b1.shape),
        _const_spec(w2.shape), _const_spec(b2.shape),
        _const_spec(w3.shape), _const_spec(b3.shape),
        _const_spec(w4.shape), _const_spec(b4.shape),
    ]

    out = pl.pallas_call(
        encoder_kernel,
        out_shape=jax.ShapeDtypeStruct((B, c_out), jnp.float32),
        grid_spec=pltpu.PrefetchScalarGridSpec(
            num_scalar_prefetch=0,
            grid=(num_steps,),
            in_specs=in_specs,
            out_specs=pl.BlockSpec((TB, c_out), lambda b: (b, 0)),
        ),
        compiler_params=pltpu.CompilerParams(
            dimension_semantics=("parallel",)),
    )(x_nlc, w1, b1, w2, b2, w3, b3, w4, b4)
    return out


def make_params(key):
    """Deterministic synthetic parameters matching the PyTorch module shapes,
    with eval-mode BatchNorm folded into each conv's weight/bias.

    Layer 1 weight stays f32 (VPU path); layers 2-4 weights are stored bf16
    (MXU operands).  All biases stay f32 (f32 epilogue)."""
    eps = 1e-5
    dims = [(3, 64), (64, 128), (128, 256), (256, 128)]
    params = []
    for i, (cin, cout) in enumerate(dims):
        k = jax.random.fold_in(key, i)
        kw, kb, kg, kbeta, km, kv = jax.random.split(k, 6)
        # Conv1d(cin, cout, kernel_size=1): weight (cout, cin, 1), bias (cout,)
        w = jax.random.normal(kw, (cout, cin), jnp.float32) * (1.0 / jnp.sqrt(cin))
        b = jax.random.normal(kb, (cout,), jnp.float32) * 0.01
        # BatchNorm1d(cout): gamma, beta, running_mean, running_var (eval mode)
        gamma = 1.0 + 0.1 * jax.random.normal(kg, (cout,), jnp.float32)
        beta = 0.1 * jax.random.normal(kbeta, (cout,), jnp.float32)
        rmean = 0.1 * jax.random.normal(km, (cout,), jnp.float32)
        rvar = jnp.abs(1.0 + 0.1 * jax.random.normal(kv, (cout,), jnp.float32))
        # Fold BN (eval mode) into the conv affine (in f32).
        scale = gamma / jnp.sqrt(rvar + eps)                 # (cout,)
        w_f = (w * scale[:, None]).T                         # (cin, cout) for X @ W
        b_f = ((b - rmean) * scale + beta)[None, :]          # (1, cout)
        if i > 0:
            w_f = w_f.astype(jnp.bfloat16)                   # MXU operand layers
        params.append((w_f, b_f))
    return params


def reference_forward(x_ncw, params):
    """Pure-JAX reference using the same bf16-operand / f32-accumulate math."""
    x = jnp.transpose(x_ncw, (0, 2, 1)).astype(jnp.float32)  # (B, N, 3)
    (w1, b1), (w2, b2), (w3, b3), (w4, b4) = params
    h = jnp.maximum(jnp.dot(x, w1) + b1, 0.0)
    h = jnp.maximum(jnp.dot(h.astype(jnp.bfloat16), w2,
                            preferred_element_type=jnp.float32) + b2, 0.0)
    h = jnp.maximum(jnp.dot(h.astype(jnp.bfloat16), w3,
                            preferred_element_type=jnp.float32) + b3, 0.0)
    h = jnp.dot(h.astype(jnp.bfloat16), w4,
                preferred_element_type=jnp.float32) + b4
    return jnp.max(h, axis=1)                                # (B, 128)


if __name__ == "__main__":
    key = jax.random.PRNGKey(0)
    kx, kp = jax.random.split(key)

    B, N = 2, 128                       # batch of 2, 128 points per cloud
    x = jax.random.normal(kx, (B, 3, N), jnp.float32)   # PyTorch NCW input
    params = make_params(kp)

    out = encoder_forward(x, params)
    out = jax.block_until_ready(out)

    ref = reference_forward(x, params)
    assert out.shape == (B, 128), out.shape
    max_err = float(jnp.max(jnp.abs(out - ref)))
    assert jnp.allclose(out, ref, atol=1e-2, rtol=1e-2), max_err

    print("KERNEL_OK")
</pallas_src>

<mosaic_0001>
module attributes {stable_mosaic.version = 11 : i64} {
  func.func @encoder_kernel(%arg0: i32, %arg1: memref<2x128x3xf32, #tpu.memory_space<vmem>>, %arg2: memref<3x64xf32, #tpu.memory_space<vmem>>, %arg3: memref<1x64xf32, #tpu.memory_space<vmem>>, %arg4: memref<64x128xbf16, #tpu.memory_space<vmem>>, %arg5: memref<1x128xf32, #tpu.memory_space<vmem>>, %arg6: memref<128x256xbf16, #tpu.memory_space<vmem>>, %arg7: memref<1x256xf32, #tpu.memory_space<vmem>>, %arg8: memref<256x128xbf16, #tpu.memory_space<vmem>>, %arg9: memref<1x128xf32, #tpu.memory_space<vmem>>, %arg10: memref<2x128xf32, #tpu.memory_space<vmem>>) attributes {dimension_semantics = [#tpu.dimension_semantics<parallel>], iteration_bounds = array<i64: 1>, scalar_prefetch = 0 : i64, scratch_operands = 0 : i64, tpu.core_type = #tpu.core_type<tc>, window_params = [{transform_indices = @transform_0, window_bounds = array<i64: 2, 128, 3>}, {pipeline_mode = #tpu.pipeline_mode<synchronous>, transform_indices = @transform_1, window_bounds = array<i64: 3, 64>}, {pipeline_mode = #tpu.pipeline_mode<synchronous>, transform_indices = @transform_2, window_bounds = array<i64: 1, 64>}, {pipeline_mode = #tpu.pipeline_mode<synchronous>, transform_indices = @transform_3, window_bounds = array<i64: 64, 128>}, {pipeline_mode = #tpu.pipeline_mode<synchronous>, transform_indices = @transform_4, window_bounds = array<i64: 1, 128>}, {pipeline_mode = #tpu.pipeline_mode<synchronous>, transform_indices = @transform_5, window_bounds = array<i64: 128, 256>}, {pipeline_mode = #tpu.pipeline_mode<synchronous>, transform_indices = @transform_6, window_bounds = array<i64: 1, 256>}, {pipeline_mode = #tpu.pipeline_mode<synchronous>, transform_indices = @transform_7, window_bounds = array<i64: 256, 128>}, {pipeline_mode = #tpu.pipeline_mode<synchronous>, transform_indices = @transform_8, window_bounds = array<i64: 1, 128>}, {transform_indices = @transform_9, window_bounds = array<i64: 2, 128>}]} {
    %c0 = arith.constant 0 : index
    %c0_0 = arith.constant 0 : index
    %c0_1 = arith.constant 0 : index
    %0 = vector.load %arg1[%c0, %c0_0, %c0_1] : memref<2x128x3xf32, #tpu.memory_space<vmem>>, vector<2x128x3xf32>
    %1 = vector.shape_cast %0 : vector<2x128x3xf32> to vector<256x3xf32>
    %c0_2 = arith.constant 0 : index
    %c0_3 = arith.constant 0 : index
    %2 = vector.load %arg2[%c0_2, %c0_3] : memref<3x64xf32, #tpu.memory_space<vmem>>, vector<3x64xf32>
    %3 = vector.extract_strided_slice %1 {offsets = [0, 0], sizes = [256, 1], strides = [1, 1]} : vector<256x3xf32> to vector<256x1xf32>
    %4 = vector.extract_strided_slice %2 {offsets = [0, 0], sizes = [1, 64], strides = [1, 1]} : vector<3x64xf32> to vector<1x64xf32>
    %5 = vector.broadcast %3 : vector<256x1xf32> to vector<256x64xf32>
    %6 = vector.broadcast %4 : vector<1x64xf32> to vector<256x64xf32>
    %7 = arith.mulf %5, %6 : vector<256x64xf32>
    %8 = vector.extract_strided_slice %1 {offsets = [0, 1], sizes = [256, 1], strides = [1, 1]} : vector<256x3xf32> to vector<256x1xf32>
    %9 = vector.extract_strided_slice %2 {offsets = [1, 0], sizes = [1, 64], strides = [1, 1]} : vector<3x64xf32> to vector<1x64xf32>
    %10 = vector.broadcast %8 : vector<256x1xf32> to vector<256x64xf32>
    %11 = vector.broadcast %9 : vector<1x64xf32> to vector<256x64xf32>
    %12 = arith.mulf %10, %11 : vector<256x64xf32>
    %13 = arith.addf %7, %12 : vector<256x64xf32>
    %14 = vector.extract_strided_slice %1 {offsets = [0, 2], sizes = [256, 1], strides = [1, 1]} : vector<256x3xf32> to vector<256x1xf32>
    %15 = vector.extract_strided_slice %2 {offsets = [2, 0], sizes = [1, 64], strides = [1, 1]} : vector<3x64xf32> to vector<1x64xf32>
    %16 = vector.broadcast %14 : vector<256x1xf32> to vector<256x64xf32>
    %17 = vector.broadcast %15 : vector<1x64xf32> to vector<256x64xf32>
    %18 = arith.mulf %16, %17 : vector<256x64xf32>
    %19 = arith.addf %13, %18 : vector<256x64xf32>
    %c0_4 = arith.constant 0 : index
    %c0_5 = arith.constant 0 : index
    %20 = vector.load %arg3[%c0_4, %c0_5] : memref<1x64xf32, #tpu.memory_space<vmem>>, vector<1x64xf32>
    %21 = vector.broadcast %20 : vector<1x64xf32> to vector<256x64xf32>
    %22 = arith.addf %19, %21 : vector<256x64xf32>
    %cst = arith.constant 0.000000e+00 : f32
    %23 = vector.broadcast %cst : f32 to vector<256x64xf32>
    %24 = arith.maximumf %22, %23 : vector<256x64xf32>
    %25 = arith.truncf %24 : vector<256x64xf32> to vector<256x64xbf16>
    %c0_6 = arith.constant 0 : index
    %c0_7 = arith.constant 0 : index
    %26 = vector.load %arg4[%c0_6, %c0_7] : memref<64x128xbf16, #tpu.memory_space<vmem>>, vector<64x128xbf16>
    %cst_8 = arith.constant dense<0.000000e+00> : vector<256x128xf32>
    %27 = tpu.matmul %25, %26, %cst_8 {dimension_numbers = #tpu.dot_dimension_numbers<[1], [0], [0], [1], [0, 0, 1, 1], [], []>} : vector<256x64xbf16>, vector<64x128xbf16>, vector<256x128xf32> -> vector<256x128xf32>
    %c0_9 = arith.constant 0 : index
    %c0_10 = arith.constant 0 : index
    %28 = vector.load %arg5[%c0_9, %c0_10] : memref<1x128xf32, #tpu.memory_space<vmem>>, vector<1x128xf32>
    %29 = vector.broadcast %28 : vector<1x128xf32> to vector<256x128xf32>
    %30 = arith.addf %27, %29 : vector<256x128xf32>
    %cst_11 = arith.constant 0.000000e+00 : f32
    %31 = vector.broadcast %cst_11 : f32 to vector<256x128xf32>
    %32 = arith.maximumf %30, %31 : vector<256x128xf32>
    %33 = arith.truncf %32 : vector<256x128xf32> to vector<256x128xbf16>
    %c0_12 = arith.constant 0 : index
    %c0_13 = arith.constant 0 : index
    %34 = vector.load %arg6[%c0_12, %c0_13] : memref<128x256xbf16, #tpu.memory_space<vmem>>, vector<128x256xbf16>
    %cst_14 = arith.constant dense<0.000000e+00> : vector<256x256xf32>
    %35 = tpu.matmul %33, %34, %cst_14 {dimension_numbers = #tpu.dot_dimension_numbers<[1], [0], [0], [1], [0, 0, 1, 1], [], []>} : vector<256x128xbf16>, vector<128x256xbf16>, vector<256x256xf32> -> vector<256x256xf32>
    %c0_15 = arith.constant 0 : index
    %c0_16 = arith.constant 0 : index
    %36 = vector.load %arg7[%c0_15, %c0_16] : memref<1x256xf32, #tpu.memory_space<vmem>>, vector<1x256xf32>
    %37 = vector.broadcast %36 : vector<1x256xf32> to vector<256x256xf32>
    %38 = arith.addf %35, %37 : vector<256x256xf32>
    %cst_17 = arith.constant 0.000000e+00 : f32
    %39 = vector.broadcast %cst_17 : f32 to vector<256x256xf32>
    %40 = arith.maximumf %38, %39 : vector<256x256xf32>
    %41 = arith.truncf %40 : vector<256x256xf32> to vector<256x256xbf16>
    %c0_18 = arith.constant 0 : index
    %c0_19 = arith.constant 0 : index
    %42 = vector.load %arg8[%c0_18, %c0_19] : memref<256x128xbf16, #tpu.memory_space<vmem>>, vector<256x128xbf16>
    %cst_20 = arith.constant dense<0.000000e+00> : vector<256x128xf32>
    %43 = tpu.matmul %41, %42, %cst_20 {dimension_numbers = #tpu.dot_dimension_numbers<[1], [0], [0], [1], [0, 0, 1, 1], [], []>} : vector<256x256xbf16>, vector<256x128xbf16>, vector<256x128xf32> -> vector<256x128xf32>
    %c0_21 = arith.constant 0 : index
    %c0_22 = arith.constant 0 : index
    %44 = vector.load %arg9[%c0_21, %c0_22] : memref<1x128xf32, #tpu.memory_space<vmem>>, vector<1x128xf32>
    %45 = vector.broadcast %44 : vector<1x128xf32> to vector<256x128xf32>
    %46 = arith.addf %43, %45 : vector<256x128xf32>
    %47 = vector.shape_cast %46 : vector<256x128xf32> to vector<2x128x128xf32>
    %cst_23 = arith.constant dense<0xFF800000> : vector<2x128xf32>
    %48 = vector.multi_reduction <maximumf>, %47, %cst_23 [1] : vector<2x128x128xf32> to vector<2x128xf32>
    %c0_24 = arith.constant 0 : index
    %c0_25 = arith.constant 0 : index
    %49 = vector.load %arg10[%c0_24, %c0_25] : memref<2x128xf32, #tpu.memory_space<vmem>>, vector<2x128xf32>
    tpu.vector_store %arg10[%c0_24, %c0_25], %48 {strides = array<i32>} : memref<2x128xf32, #tpu.memory_space<vmem>>, vector<2x128xf32>,
    return
  }
  func.func @transform_0(%arg0: i32) -> (i32, i32, i32) {
    %c0_i32 = arith.constant 0 : i32
    %c0_i32_0 = arith.constant 0 : i32
    %c0_i32_1 = arith.constant 0 : i32
    return %arg0, %c0_i32, %c0_i32_0 : i32, i32, i32
  }
  func.func @transform_1(%arg0: i32) -> (i32, i32) {
    %c0_i32 = arith.constant 0 : i32
    %c0_i32_0 = arith.constant 0 : i32
    %c0_i32_1 = arith.constant 0 : i32
    return %c0_i32, %c0_i32_0 : i32, i32
  }
  func.func @transform_2(%arg0: i32) -> (i32, i32) {
    %c0_i32 = arith.constant 0 : i32
    %c0_i32_0 = arith.constant 0 : i32
    %c0_i32_1 = arith.constant 0 : i32
    return %c0_i32, %c0_i32_0 : i32, i32
  }
  func.func @transform_3(%arg0: i32) -> (i32, i32) {
    %c0_i32 = arith.constant 0 : i32
    %c0_i32_0 = arith.constant 0 : i32
    %c0_i32_1 = arith.constant 0 : i32
    return %c0_i32, %c0_i32_0 : i32, i32
  }
  func.func @transform_4(%arg0: i32) -> (i32, i32) {
    %c0_i32 = arith.constant 0 : i32
    %c0_i32_0 = arith.constant 0 : i32
    %c0_i32_1 = arith.constant 0 : i32
    return %c0_i32, %c0_i32_0 : i32, i32
  }
  func.func @transform_5(%arg0: i32) -> (i32, i32) {
    %c0_i32 = arith.constant 0 : i32
    %c0_i32_0 = arith.constant 0 : i32
    %c0_i32_1 = arith.constant 0 : i32
    return %c0_i32, %c0_i32_0 : i32, i32
  }
  func.func @transform_6(%arg0: i32) -> (i32, i32) {
    %c0_i32 = arith.constant 0 : i32
    %c0_i32_0 = arith.constant 0 : i32
    %c0_i32_1 = arith.constant 0 : i32
    return %c0_i32, %c0_i32_0 : i32, i32
  }
  func.func @transform_7(%arg0: i32) -> (i32, i32) {
    %c0_i32 = arith.constant 0 : i32
    %c0_i32_0 = arith.constant 0 : i32
    %c0_i32_1 = arith.constant 0 : i32
    return %c0_i32, %c0_i32_0 : i32, i32
  }
  func.func @transform_8(%arg0: i32) -> (i32, i32) {
    %c0_i32 = arith.constant 0 : i32
    %c0_i32_0 = arith.constant 0 : i32
    %c0_i32_1 = arith.constant 0 : i32
    return %c0_i32, %c0_i32_0 : i32, i32
  }
  func.func @transform_9(%arg0: i32) -> (i32, i32) {
    %c0_i32 = arith.constant 0 : i32
    %c0_i32_0 = arith.constant 0 : i32
    return %arg0, %c0_i32 : i32, i32
  }
}

</mosaic_0001>

<bundles_post_ra>
// kernel: encoder_forward.1
= control target key start
LH: loop header
LB: loop body
LE: loop exit
PB: predicated region body
PF: predicated region fallthrough
CT: control target
= control target key end

     0   :  { %14 = vsyncpa [#allocation3], 0  ;;  %s2947_s0 = inlined_call_operand.vmem [shape: f32[2,128,3], index: 0, kind: input, shape index: {}]   ;;  %s2948_s1 = inlined_call_operand.vmem [shape: f32[3,64], index: 1, kind: input, shape index: {}]   ;;  %s2949_s2 = inlined_call_operand.vmem [shape: f32[1,64], index: 2, kind: input, shape index: {}]   ;;  %s2950_s3 = inlined_call_operand.hbm [shape: bf16[64,128], index: 3, kind: input, shape index: {}]   ;;  %s2951_s4 = inlined_call_operand.vmem [shape: f32[1,128], index: 4, kind: input, shape index: {}]   ;;  %s2952_s5 = inlined_call_operand.vmem [shape: bf16[128,256], index: 5, kind: input, shape index: {}]   ;;  %s2953_s6 = inlined_call_operand.vmem [shape: f32[1,256], index: 6, kind: input, shape index: {}]   ;;  %s2954_s7 = inlined_call_operand.vmem [shape: bf16[256,128], index: 7, kind: input, shape index: {}]   ;;  %s2955_s8 = inlined_call_operand.vmem [shape: f32[1,128], index: 8, kind: input, shape index: {}]   ;;  %s2956_s9 = inlined_call_operand.hbm [shape: f32[2,128], index: 9, kind: output, shape index: {}]  }
   0x1   :  { %15 = vsyncpa [#allocation4], 0  ;;  %s2190_s30 = smov [#allocation2]   ;;  %s2142_s13 = scalar_lea.hbm %s2950_s3, 512 }
   0x2   :  { %s27_s10 = sshll.u32 %s2190_s30, 4  ;;  %p2143_p0 = scmp.ne.s32.totalorder %s2950_s3, %s2142_s13  ;;  %s28_s10 = int_to_ptr.vmem [resolvable:$true] %s27_s10 }
   0x3   :  { %p2146_p1 = scmp.lt.u32.totalorder %s2142_s13, %s2950_s3 }
   0x5   :  { %p2148_p2 = pnand %p2146_p1, %p2143_p0 }
   0x7   :  { %2151 = shalt.err (!%p2148_p2)
}
   0x8   :  { %s2152_s18 = scalar_lea.vmem %s28_s10, 512  ;;  %p2157_p4 = scmp.lt.s32.totalorder %s28_s10, %s28_s10 }
   0x9   :  { %p2153_p3 = scmp.ne.s32.totalorder %s28_s10, %s2152_s18  ;;  %p2158_p5 = scmp.lt.s32.totalorder %s2152_s18, %s2152_s18 }
   0xb   :  { %p2159_p6 = por %p2158_p5, %p2157_p4 }
   0xd   :  { %p2160_p7 = pnand %p2159_p6, %p2153_p3 }
   0xf   :  { %2163 = shalt.err (!%p2160_p7)
}
  0x10   :  { %s2191_s19 = smov 64   ;;  %s2192_s20 = smov 4  }
  0x11   :  { %33 = dma.hbm_to_vmem [thread:$0]  %s2950_s3, 512, %s28_s10, [#allocation3], %s2191_s19, %s2191_s19, %s2192_s20  }
  0x12   :  { %2186 = dma.done.wait [#allocation3], 512  }
  0x13   :  { %2187 = vsyncadd [#allocation3], 4294966784  ;;  %v2193_v0 = vmov 1   ;;  %v50_v1 = vld [vmem:[%s2947_s0 + $0x10] sm:$0xff]  ;;  %v48_v2 = vld [vmem:[%s2947_s0] sm:$0xff]  ;;  %v2194_v4 = vmov 2   ;;  %v241_v37 = vlaneseq }
  0x14   :  { %2053 = vset.pattern.permute.xlu0 %v2193_v0  ;;  %2051 = vset.pattern.permute.xlu1 %v2193_v0  ;;  %v49_v3 = vld [vmem:[%s2947_s0 + $0x8] sm:$0xff]  ;;  %v52_v5 = vld [vmem:[%s2947_s0 + $0x20] sm:$0xff]  ;;  %v51_v6 = vld [vmem:[%s2947_s0 + $0x18] sm:$0xff]  ;;  %v2195_v7 = vmov 0   ;;  %vm795_vm0 = vcmask 523264   ;;  %vm1790_vm1 = vcmask 1041409  }
  0x15   :  { %286 = vperm.xlu0 %2053, %v50_v1   ;;  %278 = vperm.xlu1 %2051, %v48_v2   ;;  %v55_v8 = vld [vmem:[%s2947_s0 + $0x38] sm:$0xff]  ;;  %v2284_v9 = vld [vmem:[%s2947_s0 + $0x48] sm:$0xff]  ;;  %v2098_v10 = vld [vmem:[#allocation2] sm:$0xff]   ;;  %v2408_v41 = vshrl.u32 %v241_v37, 7 }
  0x16   :  { %1996 = vmatprep.subr.bf16.mxu0 %v2098_v10  ;;  %v2099_v11 = vld [vmem:[#allocation2 + $0x8] sm:$0xff]   ;;  %2036 = vmatprep.subr.bf16.mxu1 %v2098_v10  ;;  %v2100_v13 = vld [vmem:[#allocation2 + $0x10] sm:$0xff]   ;;  %v2101_v14 = vld [vmem:[#allocation2 + $0x18] sm:$0xff]  }
  0x17   :  { %1997 = vmatpush3.bf16.msra.mxu0 %v2098_v10  ;;  %v53_v12 = vld [vmem:[%s2947_s0 + $0x28] sm:$0xff]  ;;  %2040 = vmatpush3.bf16.msra.mxu1 %v2098_v10  ;;  %v58_v15 = vld [vmem:[%s2947_s0 + $0x50] sm:$0xff]  ;;  %v60_v17 = vld [vmem:[%s2947_s0 + $0x60] sm:$0xff]  ;;  %v407_v45 = vsub.s32 1, %v2408_v41  ;;  %v603_v47 = vsub.s32 2, %v2408_v41  ;;  %v243_v48 = vsub.s32 0, %v2408_v41 }
  0x18   :  { %1998 = vmatprep.subr.bf16.mxu0 %v2099_v11  ;;  %2037 = vmatprep.subr.bf16.mxu1 %v2099_v11  ;;  %v54_v16 = vld [vmem:[%s2947_s0 + $0x30] sm:$0xff]  ;;  %v2309_v18 = vld [vmem:[%s2947_s0 + $0x88] sm:$0xff]  ;;  %v56_v20 = vld [vmem:[%s2947_s0 + $0x40] sm:$0xff] }
  0x19   :  { %2056 = vset.pattern.permute.xlu0 %v2194_v4  ;;  %282 = vperm.xlu1 %2051, %v49_v3   ;;  %v2316_v19 = vld [vmem:[%s2947_s0 + $0x90] sm:$0xff]  ;;  %v61_v21 = vld [vmem:[%s2947_s0 + $0x68] sm:$0xff]  ;;  %v59_v23 = vld [vmem:[%s2947_s0 + $0x58] sm:$0xff] }
  0x1a   :  { %478 = vperm.xlu0 %2056, %v49_v3   ;;  %v62_v22 = vld [vmem:[%s2947_s0 + $0x70] sm:$0xff]  ;;  %v2341_v24 = vld [vmem:[%s2947_s0 + $0xa8] sm:$0xff]  ;;  %v63_v26 = vld [vmem:[%s2947_s0 + $0x78] sm:$0xff] }
  0x1b   :  { %1999 = vmatpush3.bf16.msra.mxu0 %v2099_v11  ;;  %2041 = vmatpush3.bf16.msra.mxu1 %v2099_v11  ;;  %v2348_v25 = vld [vmem:[%s2947_s0 + $0xb0] sm:$0xff]  ;;  %v2361_v27 = vld [vmem:[%s2947_s0 + $0xa0] sm:$0xff]  ;;  %v2367_v28 = vld [vmem:[%s2947_s0 + $0xb8] sm:$0xff] }
  0x1c   :  { %2000 = vmatprep.subr.bf16.mxu0 %v2100_v13  ;;  %2038 = vmatprep.subr.bf16.mxu1 %v2100_v13  ;;  %v2374_v29 = vld [vmem:[%s2947_s0 + $0xc8] sm:$0xff]  ;;  %v2385_v30 = vld [vmem:[%s2947_s0 + $0xd0] sm:$0xff]  ;;  %v2392_v31 = vld [vmem:[%s2947_s0 + $0xe0] sm:$0xff] }
  0x1d   :  { %2052 = vset.pattern.permute.xlu1 %v2195_v7  ;;  %v64_v36 = vld [vmem:[%s2947_s0 + $0x80] sm:$0xff]  ;;  %v2404_v38 = vld [vmem:[%s2947_s0 + $0xe8] sm:$0xff]  ;;  %v2415_v42 = vld [vmem:[%s2947_s0 + $0xf0] sm:$0xff] }
  0x1e   :  { %490 = vperm.xlu0 %2056, %v52_v5   ;;  %98 = vperm.xlu1 %2052, %v51_v6   ;;  %v80_v46 = vld [vmem:[%s2948_s1] sm:$0x7]  ;;  %v67_v52 = vld [vmem:[%s2947_s0 + $0x98] sm:$0xff] }
  0x1f   :  { %2001 = vmatpush3.bf16.msra.mxu0 %v2100_v13  ;;  %2042 = vmatpush3.bf16.msra.mxu1 %v2100_v13  ;;  %v2431_v50 = vrot.slane %v80_v46, %v407_v45  ;;  %v2438_v53 = vrot.slane %v80_v46, %v603_v47  ;;  %v2442_v54 = vrot.slane %v80_v46, %v243_v48  ;;  %v2450_v59 = vld [vmem:[%s2947_s0 + $0xf8] sm:$0xff] }
  0x20   :  { %2002 = vmatprep.subr.bf16.mxu0 %v2101_v14  ;;  %2039 = vmatprep.subr.bf16.mxu1 %v2101_v14 }
  0x22   :  { %502 = vperm.xlu0 %2056, %v55_v8   ;;  %2054 = vset.pattern.permute.xlu1 %v2193_v0 }
  0x23   :  { %290 = vperm.xlu1 %2054, %v51_v6   ;;  %2003 = vmatpush3.bf16.msra.mxu0 %v2101_v14 }
  0x24   :  { %2043 = vmatpush3.bf16.msra.mxu1 %v2101_v14 }
  0x26   :  { %510 = vperm.xlu0 %2056, %v2284_v9  }
  0x27   :  { %2055 = vset.pattern.permute.xlu1 %v2194_v4 }
  0x28   :  { %474 = vperm.xlu1 %2055, %v48_v2  }
  0x2a   :  { %2067 = vset.pattern.permute.xlu0 %v2195_v7 }
  0x2b   :  { %83 = vperm.xlu0 %2067, %v48_v2  }
  0x2c   :  { %482 = vperm.xlu1 %2055, %v50_v1  }
  0x2f   :  { %88 = vperm.xlu0 %2067, %v49_v3  }
  0x30   :  { %486 = vperm.xlu1 %2055, %v51_v6  }
  0x33   :  { %93 = vperm.xlu0 %2067, %v50_v1  }
  0x34   :  { %2057 = vset.pattern.permute.xlu1 %v2195_v7 }
  0x35   :  { %108 = vperm.xlu1 %2057, %v53_v12  }
  0x37   :  { %103 = vperm.xlu0 %2067, %v52_v5  }
  0x39   :  { %2058 = vset.pattern.permute.xlu1 %v2193_v0 }
  0x3a   :  { %294 = vperm.xlu1 %2058, %v52_v5  }
  0x3b   :  { %128 = vperm.xlu0 %2067, %v2284_v9  }
  0x3e   :  { %2059 = vset.pattern.permute.xlu1 %v2195_v7 }
  0x3f   :  { %133 = vperm.xlu0 %2067, %v58_v15   ;;  %113 = vperm.xlu1 %2059, %v54_v16  }
  0x43   :  { %143 = vperm.xlu0 %2067, %v60_v17   ;;  %118 = vperm.xlu1 %2059, %v55_v8  }
  0x47   :  { %168 = vperm.xlu0 %2067, %v2309_v18   ;;  %2060 = vset.pattern.permute.xlu1 %v2193_v0 }
  0x48   :  { %306 = vperm.xlu1 %2060, %v55_v8  }
  0x4b   :  { %173 = vperm.xlu0 %2067, %v2316_v19  }
  0x4c   :  { %2061 = vset.pattern.permute.xlu1 %v2194_v4 }
  0x4d   :  { %494 = vperm.xlu1 %2061, %v53_v12  }
  0x4f   :  { %2075 = vset.pattern.permute.xlu0 %v2193_v0 }
  0x50   :  { %298 = vperm.xlu0 %2075, %v53_v12  }
  0x51   :  { %498 = vperm.xlu1 %2061, %v54_v16  }
  0x54   :  { %302 = vperm.xlu0 %2075, %v54_v16  }
  0x55   :  { %2062 = vset.pattern.permute.xlu1 %v2195_v7 }
  0x56   :  { %123 = vperm.xlu1 %2062, %v56_v20  }
  0x58   :  { %318 = vperm.xlu0 %2075, %v58_v15  }
  0x5a   :  { %2063 = vset.pattern.permute.xlu1 %v2193_v0 }
  0x5b   :  { %310 = vperm.xlu1 %2063, %v56_v20  }
  0x5c   :  { %330 = vperm.xlu0 %2075, %v61_v21  }
  0x5f   :  { %314 = vperm.xlu1 %2063, %v2284_v9   ;;  %v2463_v9 = vld [vmem:[%s2949_s2] ss:$0 sm:$0xff] }
  0x60   :  { %334 = vperm.xlu0 %2075, %v62_v22  }
  0x63   :  { %2064 = vset.pattern.permute.xlu1 %v2195_v7 }
  0x64   :  { %138 = vperm.xlu1 %2064, %v59_v23   ;;  %350 = vperm.xlu0 %2075, %v2316_v19  }
  0x68   :  { %2065 = vset.pattern.permute.xlu1 %v2193_v0  ;;  %362 = vperm.xlu0 %2075, %v2341_v24  }
  0x69   :  { %322 = vperm.xlu1 %2065, %v59_v23  }
  0x6c   :  { %366 = vperm.xlu0 %2075, %v2348_v25  }
  0x6d   :  { %2066 = vset.pattern.permute.xlu1 %v2194_v4 }
  0x6e   :  { %506 = vperm.xlu1 %2066, %v56_v20  }
  0x70   :  { %2082 = vset.pattern.permute.xlu0 %v2194_v4 }
  0x71   :  { %522 = vperm.xlu0 %2082, %v60_v17  }
  0x72   :  { %514 = vperm.xlu1 %2066, %v58_v15  }
  0x75   :  { %534 = vperm.xlu0 %2082, %v63_v26  }
  0x76   :  { %518 = vperm.xlu1 %2066, %v59_v23  }
  0x79   :  { %542 = vperm.xlu0 %2082, %v2309_v18  }
  0x7a   :  { %2068 = vset.pattern.permute.xlu1 %v2195_v7 }
  0x7b   :  { %148 = vperm.xlu1 %2068, %v61_v21  }
  0x7d   :  { %554 = vperm.xlu0 %2082, %v2361_v27  }
  0x7f   :  { %2069 = vset.pattern.permute.xlu1 %v2193_v0 }
  0x80   :  { %326 = vperm.xlu1 %2069, %v60_v17  }
  0x81   :  { %566 = vperm.xlu0 %2082, %v2367_v28  }
  0x84   :  { %2070 = vset.pattern.permute.xlu1 %v2195_v7 }
  0x85   :  { %153 = vperm.xlu1 %2070, %v62_v22   ;;  %574 = vperm.xlu0 %2082, %v2374_v29  }
  0x89   :  { %158 = vperm.xlu1 %2070, %v63_v26   ;;  %2090 = vset.pattern.permute.xlu0 %v2195_v7 }
  0x8a   :  { %183 = vperm.xlu0 %2090, %v2361_v27  }
  0x8d   :  { %2071 = vset.pattern.permute.xlu1 %v2193_v0 }
  0x8e   :  { %338 = vperm.xlu1 %2071, %v63_v26   ;;  %208 = vperm.xlu0 %2090, %v2374_v29  }
  0x92   :  { %2072 = vset.pattern.permute.xlu1 %v2194_v4  ;;  %213 = vperm.xlu0 %2090, %v2385_v30  }
  0x93   :  { %526 = vperm.xlu1 %2072, %v61_v21  }
  0x94   :  { %v279_v32 = vpop.permute.xlu1 %278  ;;  %v287_v33 = vpop.permute.xlu0 %286 }
  0x95   :  { %v409_v56 = vmul.f32 %v2431_v50, %v279_v32  ;;  %v411_v11 = vmul.f32 %v2431_v50, %v287_v33 }
  0x96   :  { %223 = vperm.xlu0 %2090, %v2392_v31  }
  0x97   :  { %530 = vperm.xlu1 %2072, %v62_v22  }
  0x98   :  { %v283_v34 = vpop.permute.xlu1 %282 }
  0x99   :  { %v479_v35 = vpop.permute.xlu0 %478  ;;  %v410_v63 = vmul.f32 %v2431_v50, %v283_v34 }
  0x9a   :  { %2091 = vset.pattern.permute.xlu0 %v2193_v0  ;;  %v606_v2 = vmul.f32 %v2438_v53, %v479_v35 }
  0x9b   :  { %2073 = vset.pattern.permute.xlu1 %v2195_v7  ;;  %382 = vperm.xlu0 %2091, %v2385_v30  }
  0x9c   :  { %163 = vperm.xlu1 %2073, %v64_v36  }
  0x9d   :  { %v99_v39 = vpop.permute.xlu1 %98  ;;  %v2406_v40 = vpop.permute.xlu0 %490 }
  0x9e   :  { %v248_v3 = vmul.f32 %v2442_v54, %v99_v39 }
  0x9f   :  { %394 = vperm.xlu0 %2091, %v2404_v38  }
  0xa0   :  { %2074 = vset.pattern.permute.xlu1 %v2193_v0 }
  0xa1   :  { %342 = vperm.xlu1 %2074, %v64_v36   ;;  %v2417_v43 = vpop.permute.xlu0 %502 }
  0xa2   :  { %v291_v44 = vpop.permute.xlu1 %290 }
  0xa3   :  { %398 = vperm.xlu0 %2091, %v2415_v42   ;;  %v412_v60 = vmul.f32 %v2431_v50, %v291_v44 }
  0xa5   :  { %346 = vperm.xlu1 %2074, %v2309_v18   ;;  %v2427_v49 = vpop.permute.xlu0 %510  ;;  %v444_v12 = vadd.f32 %v412_v60, %v248_v3 }
  0xa7   :  { %v475_v51 = vpop.permute.xlu1 %474  ;;  %2096 = vset.pattern.permute.xlu0 %v2194_v4 }
  0xa8   :  { %586 = vperm.xlu0 %2096, %v2392_v31   ;;  %v605_v61 = vmul.f32 %v2438_v53, %v475_v51 }
  0xa9   :  { %2076 = vset.pattern.permute.xlu1 %v2195_v7 }
  0xaa   :  { %v84_v55 = vpop.permute.xlu0 %83  ;;  %178 = vperm.xlu1 %2076, %v67_v52  }
  0xab   :  { %v245_v57 = vmul.f32 %v2442_v54, %v84_v55  ;;  %v483_v58 = vpop.permute.xlu1 %482 }
  0xac   :  { %598 = vperm.xlu0 %2096, %v2450_v59   ;;  %v607_v21 = vmul.f32 %v2438_v53, %v483_v58 }
  0xad   :  { %v441_v62 = vadd.f32 %v409_v56, %v245_v57 }
  0xae   :  { %v89_v1 = vpop.permute.xlu0 %88  ;;  %2077 = vset.pattern.permute.xlu1 %v2193_v0 }
  0xaf   :  { %v637_v5 = vadd.f32 %v605_v61, %v441_v62  ;;  %v246_v6 = vmul.f32 %v2442_v54, %v89_v1  ;;  %354 = vperm.xlu1 %2077, %v67_v52   ;;  %v487_v8 = vpop.permute.xlu1 %486 }
  0xb0   :  { %v608_v10 = vmul.f32 %v2438_v53, %v487_v8 }
  0xb1   :  { %v442_v13 = vadd.f32 %v410_v63, %v246_v6  ;;  %v676_v18 = vadd.f32 %v2463_v9, %v637_v5  ;;  %v609_v63 = vmul.f32 %v2438_v53, %v2406_v40  ;;  %v612_v5 = vmul.f32 %v2438_v53, %v2417_v43 }
  0xb2   :  { %v94_v14 = vpop.permute.xlu0 %93  ;;  %v640_v16 = vadd.f32 %v608_v10, %v444_v12 }
  0xb3   :  { %v638_v15 = vadd.f32 %v606_v2, %v442_v13  ;;  %v247_v17 = vmul.f32 %v2442_v54, %v94_v14  ;;  %2078 = vset.pattern.permute.xlu1 %v2194_v4  ;;  %v708_v34 = vmax.f32 %v676_v18, 0.0 }
  0xb4   :  { %538 = vperm.xlu1 %2078, %v64_v36   ;;  %v109_v20 = vpop.permute.xlu1 %108  ;;  %v679_v32 = vadd.f32 %v2463_v9, %v640_v16 }
  0xb5   :  { %v443_v22 = vadd.f32 %v411_v11, %v247_v17  ;;  %v677_v23 = vadd.f32 %v2463_v9, %v638_v15  ;;  %v250_v8 = vmul.f32 %v2442_v54, %v109_v20 }
  0xb6   :  { %v104_v26 = vpop.permute.xlu0 %103  ;;  %v711_v46 = vmax.f32 %v679_v32, 0.0 }
  0xb7   :  { %v639_v33 = vadd.f32 %v607_v21, %v443_v22  ;;  %v709_v35 = vmax.f32 %v677_v23, 0.0  ;;  %v249_v60 = vmul.f32 %v2442_v54, %v104_v26 }
  0xb8   :  { %546 = vperm.xlu1 %2078, %v2316_v19  }
  0xb9   :  { %v678_v37 = vadd.f32 %v2463_v9, %v639_v33  ;;  %v295_v39 = vpop.permute.xlu1 %294  ;;  %v740_v44 = vpack.c.bf16 %v709_v35, %v708_v34 }
  0xba   :  { %v2475_v36 = vpop.permute.xlu0 %128  ;;  %v413_v61 = vmul.f32 %v2431_v50, %v295_v39 }
  0xbb   :  { %v710_v47 = vmax.f32 %v678_v37, 0.0  ;;  %2004 = vmatprep.mubr.msk.bf16.mxu0 %vm795_vm0, %v740_v44 }
  0xbc   :  { %550 = vperm.xlu1 %2078, %v67_v52   ;;  %v445_v1 = vadd.f32 %v413_v61, %v249_v60  ;;  %v614_v60 = vmul.f32 %v2438_v53, %v2427_v49  ;;  %v75_v49 = vld [vmem:[%s2947_s0 + $0xd8] sm:$0xff] }
  0xbd   :  { %v741_v51 = vpack.c.bf16 %v711_v46, %v710_v47 }
  0xbe   :  { %v114_v55 = vpop.permute.xlu1 %113  ;;  %v2478_v56 = vpop.permute.xlu0 %133  ;;  %v641_v10 = vadd.f32 %v609_v63, %v445_v1 }
  0xbf   :  { %2005 = vmatmul.mubr.msk.bf16.vlgmr.msra.gmra.mrb[0].mxu0 %vm795_vm0, %v741_v51  ;;  %v251_v15 = vmul.f32 %v2442_v54, %v114_v55  ;;  %v72_v55 = vld [vmem:[%s2947_s0 + $0xc0] sm:$0xff] }
  0xc0   :  { %2079 = vset.pattern.permute.xlu1 %v2195_v7  ;;  %v680_v43 = vadd.f32 %v2463_v9, %v641_v10 }
  0xc1   :  { %188 = vperm.xlu1 %2079, %v2341_v24  }
  0xc2   :  { %v119_v19 = vpop.permute.xlu1 %118  ;;  %v2483_v57 = vpop.permute.xlu0 %143  ;;  %v712_v32 = vmax.f32 %v680_v43, 0.0 }
  0xc3   :  { %v252_v3 = vmul.f32 %v2442_v54, %v119_v19  ;;  %v254_v19 = vmul.f32 %v2442_v54, %v2475_v36 }
  0xc5   :  { %2080 = vset.pattern.permute.xlu1 %v2193_v0 }
  0xc6   :  { %358 = vperm.xlu1 %2080, %v2361_v27   ;;  %v2487_v58 = vpop.permute.xlu0 %168 }
  0xc7   :  { %v307_v52 = vpop.permute.xlu1 %306 }
  0xc8   :  { %v416_v2 = vmul.f32 %v2431_v50, %v307_v52 }
  0xca   :  { %2081 = vset.pattern.permute.xlu1 %v2195_v7  ;;  %v2492_v62 = vpop.permute.xlu0 %173  ;;  %v448_v11 = vadd.f32 %v416_v2, %v252_v3  ;;  %v255_v2 = vmul.f32 %v2442_v54, %v2478_v56 }
  0xcb   :  { %193 = vperm.xlu1 %2081, %v2348_v25  }
  0xcc   :  { %v495_v27 = vpop.permute.xlu1 %494  ;;  %v644_v17 = vadd.f32 %v612_v5, %v448_v11 }
  0xcd   :  { %v610_v40 = vmul.f32 %v2438_v53, %v495_v27 }
  0xce   :  { %v683_v33 = vadd.f32 %v2463_v9, %v644_v17 }
  0xcf   :  { %v299_v6 = vpop.permute.xlu0 %298  ;;  %198 = vperm.xlu1 %2081, %v2367_v28  }
  0xd0   :  { %v414_v12 = vmul.f32 %v2431_v50, %v299_v6  ;;  %v499_v13 = vpop.permute.xlu1 %498 }
  0xd1   :  { %v611_v23 = vmul.f32 %v2438_v53, %v499_v13 }
  0xd2   :  { %v446_v14 = vadd.f32 %v414_v12, %v250_v8 }
  0xd3   :  { %v303_v16 = vpop.permute.xlu0 %302  ;;  %2083 = vset.pattern.permute.xlu1 %v2193_v0 }
  0xd4   :  { %v642_v18 = vadd.f32 %v610_v40, %v446_v14  ;;  %v415_v21 = vmul.f32 %v2431_v50, %v303_v16  ;;  %370 = vperm.xlu1 %2083, %v2367_v28   ;;  %v715_v28 = vmax.f32 %v683_v33, 0.0 }
  0xd5   :  { %v124_v20 = vpop.permute.xlu1 %123 }
  0xd6   :  { %v681_v22 = vadd.f32 %v2463_v9, %v642_v18  ;;  %v447_v26 = vadd.f32 %v415_v21, %v251_v15  ;;  %v253_v36 = vmul.f32 %v2442_v54, %v124_v20 }
  0xd8   :  { %v713_v34 = vmax.f32 %v681_v22, 0.0  ;;  %v643_v35 = vadd.f32 %v611_v23, %v447_v26  ;;  %2084 = vset.pattern.permute.xlu1 %v2194_v4 }
  0xd9   :  { %558 = vperm.xlu1 %2084, %v2341_v24  }
  0xda   :  { %v682_v37 = vadd.f32 %v2463_v9, %v643_v35  ;;  %v311_v39 = vpop.permute.xlu1 %310  ;;  %v742_v44 = vpack.c.bf16 %v713_v34, %v712_v32 }
  0xdb   :  { %v417_v1 = vmul.f32 %v2431_v50, %v311_v39 }
  0xdc   :  { %v714_v46 = vmax.f32 %v682_v37, 0.0  ;;  %2008 = vmatprep.mubr.msk.bf16.mxu0 %vm795_vm0, %v742_v44 }
  0xdd   :  { %562 = vperm.xlu1 %2084, %v2348_v25   ;;  %v319_v25 = vpop.permute.xlu0 %318  ;;  %v449_v8 = vadd.f32 %v417_v1, %v253_v36 }
  0xde   :  { %v315_v47 = vpop.permute.xlu1 %314  ;;  %v743_v51 = vpack.c.bf16 %v715_v28, %v714_v46  ;;  %v419_v3 = vmul.f32 %v2431_v50, %v319_v25 }
  0xdf   :  { %v418_v52 = vmul.f32 %v2431_v50, %v315_v47 }
  0xe0   :  { %2009 = vmatmul.mubr.msk.bf16.gmra.mrb[4].mxu0 %vm795_vm0, %v743_v51  ;;  %v451_v11 = vadd.f32 %v419_v3, %v255_v2 }
  0xe1   :  { %2085 = vset.pattern.permute.xlu1 %v2195_v7  ;;  %v450_v61 = vadd.f32 %v418_v52, %v254_v19  ;;  %v331_v5 = vpop.permute.xlu0 %330 }
  0xe2   :  { %203 = vperm.xlu1 %2085, %v72_v55   ;;  %v422_v1 = vmul.f32 %v2431_v50, %v331_v5 }
  0xe3   :  { %v139_v24 = vpop.permute.xlu1 %138  ;;  %v646_v27 = vadd.f32 %v614_v60, %v450_v61 }
  0xe4   :  { %v256_v43 = vmul.f32 %v2442_v54, %v139_v24  ;;  %v257_v24 = vmul.f32 %v2442_v54, %v2483_v57 }
  0xe5   :  { %v335_v14 = vpop.permute.xlu0 %334 }
  0xe6   :  { %2086 = vset.pattern.permute.xlu1 %v2193_v0 }
  0xe7   :  { %374 = vperm.xlu1 %2086, %v72_v55  }
  0xe8   :  { %v323_v63 = vpop.permute.xlu1 %322 }
  0xe9   :  { %v420_v13 = vmul.f32 %v2431_v50, %v323_v63  ;;  %v2548_v32 = vpop.permute.xlu0 %350 }
  0xeb   :  { %378 = vperm.xlu1 %2086, %v2374_v29   ;;  %v685_v29 = vadd.f32 %v2463_v9, %v646_v27  ;;  %v452_v20 = vadd.f32 %v420_v13, %v256_v43 }
  0xed   :  { %v507_v6 = vpop.permute.xlu1 %506  ;;  %v717_v16 = vmax.f32 %v685_v29, 0.0  ;;  %v2553_v28 = vpop.permute.xlu0 %362 }
  0xee   :  { %v613_v10 = vmul.f32 %v2438_v53, %v507_v6  ;;  %v423_v6 = vmul.f32 %v2431_v50, %v335_v14 }
  0xef   :  { %2087 = vset.pattern.permute.xlu1 %v2195_v7 }
  0xf0   :  { %v645_v56 = vadd.f32 %v613_v10, %v449_v8  ;;  %218 = vperm.xlu1 %2087, %v75_v49   ;;  %v2104_v10 = vld [vmem:[%s2952_s5 + $0x4] ss:$8 sps:$4 sm:$0xff]  }
  0xf1   :  { %v515_v12 = vpop.permute.xlu1 %514  ;;  %v2557_v47 = vpop.permute.xlu0 %366  ;;  %1161 = vmatprep.subr.bf16.mxu1 %v2104_v10 }
  0xf2   :  { %v684_v40 = vadd.f32 %v2463_v9, %v645_v56  ;;  %v615_v15 = vmul.f32 %v2438_v53, %v515_v12 }
  0xf4   :  { %v716_v17 = vmax.f32 %v684_v40, 0.0  ;;  %v647_v18 = vadd.f32 %v615_v15, %v451_v11  ;;  %2088 = vset.pattern.permute.xlu1 %v2193_v0 }
  0xf5   :  { %386 = vperm.xlu1 %2088, %v75_v49   ;;  %v519_v21 = vpop.permute.xlu1 %518  ;;  %v523_v52 = vpop.permute.xlu0 %522 }
  0xf6   :  { %v744_v22 = vpack.c.bf16 %v717_v16, %v716_v17  ;;  %v616_v23 = vmul.f32 %v2438_v53, %v519_v21  ;;  %v686_v26 = vadd.f32 %v2463_v9, %v647_v18  ;;  %v617_v25 = vmul.f32 %v2438_v53, %v523_v52 }
  0xf8   :  { %v648_v33 = vadd.f32 %v616_v23, %v452_v20  ;;  %2012 = vmatprep.mubr.msk.bf16.mxu0 %vm795_vm0, %v744_v22  ;;  %v718_v37 = vmax.f32 %v686_v26, 0.0 }
  0xf9   :  { %2089 = vset.pattern.permute.xlu1 %v2194_v4  ;;  %v535_v63 = vpop.permute.xlu0 %534 }
  0xfa   :  { %v687_v34 = vadd.f32 %v2463_v9, %v648_v33  ;;  %570 = vperm.xlu1 %2089, %v72_v55   ;;  %v149_v35 = vpop.permute.xlu1 %148  ;;  %v620_v3 = vmul.f32 %v2438_v53, %v535_v63 }
  0xfb   :  { %v258_v2 = vmul.f32 %v2442_v54, %v149_v35 }
  0xfc   :  { %v719_v39 = vmax.f32 %v687_v34, 0.0 }
  0xfd   :  { %v543_v35 = vpop.permute.xlu0 %542 }
  0xfe   :  { %v745_v44 = vpack.c.bf16 %v719_v39, %v718_v37  ;;  %578 = vperm.xlu1 %2089, %v2385_v30   ;;  %v262_v37 = vmul.f32 %v2442_v54, %v2487_v58 }
  0xff   :  { %v327_v46 = vpop.permute.xlu1 %326 }
 0x100   :  { %2013 = vmatmul.mubr.msk.bf16.gmra.mrb[8].mxu0 %vm795_vm0, %v745_v44  ;;  %v421_v19 = vmul.f32 %v2431_v50, %v327_v46  ;;  %v622_v44 = vmul.f32 %v2438_v53, %v543_v35 }
 0x102   :  { %582 = vperm.xlu1 %2089, %v75_v49   ;;  %v453_v30 = vadd.f32 %v421_v19, %v257_v24  ;;  %v454_v49 = vadd.f32 %v422_v1, %v258_v2  ;;  %v427_v24 = vmul.f32 %v2431_v50, %v2548_v32 }
 0x104   :  { %v154_v51 = vpop.permute.xlu1 %153  ;;  %v649_v36 = vadd.f32 %v617_v25, %v453_v30 }
 0x105   :  { %v259_v8 = vmul.f32 %v2442_v54, %v154_v51 }
 0x106   :  { %2092 = vset.pattern.permute.xlu1 %v2195_v7  ;;  %v688_v29 = vadd.f32 %v2463_v9, %v649_v36 }
 0x107   :  { %228 = vperm.xlu1 %2092, %v2404_v38   ;;  %v455_v13 = vadd.f32 %v423_v6, %v259_v8 }
 0x108   :  { %v159_v55 = vpop.permute.xlu1 %158  ;;  %v720_v15 = vmax.f32 %v688_v29, 0.0 }
 0x109   :  { %v260_v57 = vmul.f32 %v2442_v54, %v159_v55 }
 0x10b   :  { %2093 = vset.pattern.permute.xlu1 %v2193_v0 }
 0x10c   :  { %390 = vperm.xlu1 %2093, %v2392_v31  }
 0x10d   :  { %v339_v60 = vpop.permute.xlu1 %338 }
 0x10e   :  { %v424_v61 = vmul.f32 %v2431_v50, %v339_v60 }
 0x110   :  { %2094 = vset.pattern.permute.xlu1 %v2195_v7  ;;  %v456_v27 = vadd.f32 %v424_v61, %v260_v57  ;;  %v555_v57 = vpop.permute.xlu0 %554 }
 0x111   :  { %233 = vperm.xlu1 %2094, %v2415_v42  }
 0x112   :  { %v527_v31 = vpop.permute.xlu1 %526  ;;  %v652_v11 = vadd.f32 %v620_v3, %v456_v27 }
 0x113   :  { %v618_v5 = vmul.f32 %v2438_v53, %v527_v31 }
 0x114   :  { %v691_v16 = vadd.f32 %v2463_v9, %v652_v11  ;;  %v567_v10 = vpop.permute.xlu0 %566 }
 0x115   :  { %v650_v56 = vadd.f32 %v618_v5, %v454_v49  ;;  %238 = vperm.xlu1 %2094, %v2450_v59  }
 0x116   :  { %v531_v12 = vpop.permute.xlu1 %530  ;;  %v723_v22 = vmax.f32 %v691_v16, 0.0  ;;  %v2105_v16 = vld [vmem:[%s2952_s5 + $0x10] ss:$8 sps:$4 sm:$0xff]  }
 0x117   :  { %v689_v40 = vadd.f32 %v2463_v9, %v650_v56  ;;  %v619_v14 = vmul.f32 %v2438_v53, %v531_v12  ;;  %v2102_v12 = vld [vmem:[%s2952_s5] ss:$8 sps:$4 sm:$0xff]  }
 0x119   :  { %v721_v43 = vmax.f32 %v689_v40, 0.0  ;;  %v651_v17 = vadd.f32 %v619_v14, %v455_v13  ;;  %2095 = vset.pattern.permute.xlu1 %v2193_v0  ;;  %v2107_v40 = vld [vmem:[%s2952_s5 + $0x14] ss:$8 sps:$4 sm:$0xff]  }
 0x11a   :  { %402 = vperm.xlu1 %2095, %v2450_v59  }
 0x11b   :  { %v746_v18 = vpack.c.bf16 %v721_v43, %v720_v15  ;;  %v690_v21 = vadd.f32 %v2463_v9, %v651_v17  ;;  %v164_v20 = vpop.permute.xlu1 %163  ;;  %v2619_v15 = vpop.permute.xlu0 %574  ;;  %v2110_v43 = vld [vmem:[%s2952_s5 + $0x24] ss:$8 sps:$4 sm:$0xff]  }
 0x11d   :  { %v722_v23 = vmax.f32 %v690_v21, 0.0  ;;  %2016 = vmatprep.mubr.msk.bf16.mxu0 %vm795_vm0, %v746_v18  ;;  %v2108_v18 = vld [vmem:[%s2952_s5 + $0x20] ss:$8 sps:$4 sm:$0xff]  }
 0x11e   :  { %2097 = vset.pattern.permute.xlu1 %v2194_v4 }
 0x11f   :  { %v747_v26 = vpack.c.bf16 %v723_v22, %v722_v23  ;;  %590 = vperm.xlu1 %2097, %v2404_v38   ;;  %v261_v38 = vmul.f32 %v2442_v54, %v164_v20  ;;  %v184_v21 = vpop.permute.xlu0 %183  ;;  %v2113_v20 = vld [vmem:[%s2952_s5 + $0x34] ss:$8 sps:$4 sm:$0xff]  }
 0x120   :  { %v343_v33 = vpop.permute.xlu1 %342  ;;  %v265_v23 = vmul.f32 %v2442_v54, %v184_v21 }
 0x121   :  { %2017 = vmatmul.mubr.msk.bf16.gmra.mrb[12].mxu0 %vm795_vm0, %v747_v26  ;;  %v425_v46 = vmul.f32 %v2431_v50, %v343_v33  ;;  %v2111_v33 = vld [vmem:[%s2952_s5 + $0x30] ss:$8 sps:$4 sm:$0xff]  }
 0x123   :  { %594 = vperm.xlu1 %2097, %v2415_v42   ;;  %v263_v42 = vmul.f32 %v2442_v54, %v2492_v62  ;;  %v457_v19 = vadd.f32 %v425_v46, %v261_v38  ;;  %v430_v38 = vmul.f32 %v2431_v50, %v2553_v28 }
 0x124   :  { %v347_v0 = vpop.permute.xlu1 %346 }
 0x125   :  { %v426_v34 = vmul.f32 %v2431_v50, %v347_v0  ;;  %v459_v60 = vadd.f32 %v427_v24, %v263_v42  ;;  %v2116_v0 = vld [vmem:[%s2952_s5 + $0x44] ss:$8 sps:$4 sm:$0xff]   ;;  %v2117_v24 = vld [vmem:[%s2952_s5 + $0x50] ss:$8 sps:$4 sm:$0xff]  }
 0x127   :  { %v458_v39 = vadd.f32 %v426_v34, %v262_v37  ;;  %v2114_v37 = vld [vmem:[%s2952_s5 + $0x40] ss:$8 sps:$4 sm:$0xff]  }
 0x129   :  { %v179_v59 = vpop.permute.xlu1 %178  ;;  %v654_v51 = vadd.f32 %v622_v44, %v458_v39  ;;  %v2119_v44 = vld [vmem:[%s2952_s5 + $0x54] ss:$8 sps:$4 sm:$0xff]  }
 0x12a   :  { %v264_v2 = vmul.f32 %v2442_v54, %v179_v59  ;;  %v625_v59 = vmul.f32 %v2438_v53, %v555_v57 }
 0x12b   :  { %v693_v30 = vadd.f32 %v2463_v9, %v654_v51  ;;  %v628_v51 = vmul.f32 %v2438_v53, %v567_v10 }
 0x12d   :  { %v725_v32 = vmax.f32 %v693_v30, 0.0 }
 0x12e   :  { %v355_v4 = vpop.permute.xlu1 %354 }
 0x12f   :  { %v428_v61 = vmul.f32 %v2431_v50, %v355_v4 }
 0x131   :  { %v460_v3 = vadd.f32 %v428_v61, %v264_v2 }
 0x133   :  { %v539_v55 = vpop.permute.xlu1 %538 }
 0x134   :  { %v621_v52 = vmul.f32 %v2438_v53, %v539_v55 }
 0x136   :  { %v653_v58 = vadd.f32 %v621_v52, %v457_v19  ;;  %v2122_v52 = vld [vmem:[%s2952_s5 + $0x64] ss:$8 sps:$4 sm:$0xff]  }
 0x137   :  { %v547_v25 = vpop.permute.xlu1 %546 }
 0x138   :  { %v623_v63 = vmul.f32 %v2438_v53, %v547_v25  ;;  %v692_v1 = vadd.f32 %v2463_v9, %v653_v58  ;;  %v431_v25 = vmul.f32 %v2431_v50, %v2557_v47 }
 0x13a   :  { %v655_v62 = vadd.f32 %v623_v63, %v459_v60  ;;  %v724_v36 = vmax.f32 %v692_v1, 0.0  ;;  %v2120_v1 = vld [vmem:[%s2952_s5 + $0x60] ss:$8 sps:$4 sm:$0xff]  }
 0x13b   :  { %v551_v27 = vpop.permute.xlu1 %550 }
 0x13c   :  { %v624_v31 = vmul.f32 %v2438_v53, %v551_v27  ;;  %v748_v6 = vpack.c.bf16 %v725_v32, %v724_v36  ;;  %v694_v49 = vadd.f32 %v2463_v9, %v655_v62  ;;  %v2125_v62 = vld [vmem:[%s2952_s5 + $0x74] ss:$8 sps:$4 sm:$0xff]  }
 0x13e   :  { %v656_v8 = vadd.f32 %v624_v31, %v460_v3  ;;  %2020 = vmatprep.mubr.msk.bf16.mxu1 %vm795_vm0, %v748_v6  ;;  %v726_v11 = vmax.f32 %v694_v49, 0.0  ;;  %v2123_v6 = vld [vmem:[%s2952_s5 + $0x70] ss:$8 sps:$4 sm:$0xff]  }
 0x140   :  { %v695_v5 = vadd.f32 %v2463_v9, %v656_v8  ;;  %v189_v29 = vpop.permute.xlu1 %188 }
 0x141   :  { %v266_v4 = vmul.f32 %v2442_v54, %v189_v29 }
 0x142   :  { %v727_v56 = vmax.f32 %v695_v5, 0.0 }
 0x143   :  { %v462_v58 = vadd.f32 %v430_v38, %v266_v4 }
 0x144   :  { %v749_v13 = vpack.c.bf16 %v727_v56, %v726_v11  ;;  %v209_v56 = vpop.permute.xlu0 %208 }
 0x145   :  { %v359_v14 = vpop.permute.xlu1 %358 }
 0x146   :  { %2021 = vmatmul.mubr.msk.bf16.vlgmr.msra.gmra.mrb[0].mxu1 %vm795_vm0, %v749_v13  ;;  %v429_v26 = vmul.f32 %v2431_v50, %v359_v14 }
 0x147   :  { %1162 = vmatpush1.bf16.msra.mxu1 %v2102_v12 }
 0x148   :  { %1163 = vmatprep.subr.bf16.mxu1 %v2107_v40  ;;  %v461_v34 = vadd.f32 %v429_v26, %v265_v23  ;;  %v214_v13 = vpop.permute.xlu0 %213 }
 0x14a   :  { %v194_v17 = vpop.permute.xlu1 %193  ;;  %v657_v55 = vadd.f32 %v625_v59, %v461_v34 }
 0x14b   :  { %1164 = vmatpush1.bf16.msra.mxu1 %v2105_v16  ;;  %v267_v30 = vmul.f32 %v2442_v54, %v194_v17 }
 0x14c   :  { %1165 = vmatprep.subr.bf16.mxu1 %v2110_v43  ;;  %v696_v60 = vadd.f32 %v2463_v9, %v657_v55  ;;  %v224_v16 = vpop.permute.xlu0 %223  ;;  %v270_v43 = vmul.f32 %v2442_v54, %v209_v56 }
 0x14d   :  { %v463_v57 = vadd.f32 %v431_v25, %v267_v30 }
 0x14e   :  { %v199_v22 = vpop.permute.xlu1 %198  ;;  %v728_v32 = vmax.f32 %v696_v60, 0.0 }
 0x14f   :  { %1166 = vmatpush1.bf16.msra.mxu1 %v2108_v18  ;;  %v268_v46 = vmul.f32 %v2442_v54, %v199_v22  ;;  %v630_v22 = vmul.f32 %v2438_v53, %v2619_v15 }
 0x150   :  { %1167 = vmatprep.subr.bf16.mxu1 %v2113_v20  ;;  %v383_v20 = vpop.permute.xlu0 %382 }
 0x151   :  { %v435_v59 = vmul.f32 %v2431_v50, %v383_v20 }
 0x153   :  { %v371_v35 = vpop.permute.xlu1 %370  ;;  %1168 = vmatpush1.bf16.msra.mxu1 %v2111_v33 }
 0x154   :  { %v432_v39 = vmul.f32 %v2431_v50, %v371_v35  ;;  %1169 = vmatprep.subr.bf16.mxu1 %v2116_v0  ;;  %v271_v0 = vmul.f32 %v2442_v54, %v214_v13  ;;  %v273_v13 = vmul.f32 %v2442_v54, %v224_v16 }
 0x156   :  { %v464_v42 = vadd.f32 %v432_v39, %v268_v46  ;;  %v467_v4 = vadd.f32 %v435_v59, %v271_v0 }
 0x157   :  { %1170 = vmatpush1.bf16.msra.mxu1 %v2114_v37 }
 0x158   :  { %v559_v19 = vpop.permute.xlu1 %558  ;;  %1171 = vmatprep.subr.bf16.mxu1 %v2119_v44  ;;  %v660_v61 = vadd.f32 %v628_v51, %v464_v42 }
 0x159   :  { %v626_v28 = vmul.f32 %v2438_v53, %v559_v19 }
 0x15a   :  { %v699_v27 = vadd.f32 %v2463_v9, %v660_v61 }
 0x15b   :  { %v658_v63 = vadd.f32 %v626_v28, %v462_v58  ;;  %1172 = vmatpush1.bf16.msra.mxu1 %v2117_v24 }
 0x15c   :  { %v563_v2 = vpop.permute.xlu1 %562  ;;  %1173 = vmatprep.subr.bf16.mxu1 %v2122_v52  ;;  %v731_v10 = vmax.f32 %v699_v27, 0.0  ;;  %v2703_v27 = vld [vmem:[%s2951_s4] ss:$0 sm:$0xff] }
 0x15d   :  { %v697_v36 = vadd.f32 %v2463_v9, %v658_v63  ;;  %v627_v47 = vmul.f32 %v2438_v53, %v563_v2 }
 0x15f   :  { %v729_v3 = vmax.f32 %v697_v36, 0.0  ;;  %v659_v31 = vadd.f32 %v627_v47, %v463_v57  ;;  %1174 = vmatpush1.bf16.msra.mxu1 %v2120_v1  ;;  %v395_v57 = vpop.permute.xlu0 %394 }
 0x160   :  { %1175 = vmatprep.subr.bf16.mxu1 %v2125_v62  ;;  %v438_v0 = vmul.f32 %v2431_v50, %v395_v57 }
 0x161   :  { %v750_v49 = vpack.c.bf16 %v729_v3, %v728_v32  ;;  %v698_v8 = vadd.f32 %v2463_v9, %v659_v31  ;;  %v204_v5 = vpop.permute.xlu1 %203 }
 0x162   :  { %v269_v26 = vmul.f32 %v2442_v54, %v204_v5 }
 0x163   :  { %v730_v29 = vmax.f32 %v698_v8, 0.0  ;;  %2024 = vmatprep.mubr.msk.bf16.mxu1 %vm795_vm0, %v750_v49  ;;  %1176 = vmatpush1.bf16.msra.mxu1 %v2123_v6  ;;  %v399_v47 = vpop.permute.xlu0 %398 }
 0x165   :  { %v751_v11 = vpack.c.bf16 %v731_v10, %v730_v29 }
 0x166   :  { %v375_v12 = vpop.permute.xlu1 %374 }
 0x167   :  { %2025 = vmatmul.mubr.msk.bf16.gmra.mrb[4].mxu1 %vm795_vm0, %v751_v11  ;;  %v433_v23 = vmul.f32 %v2431_v50, %v375_v12  ;;  %v587_v56 = vpop.permute.xlu0 %586 }
 0x169   :  { %v465_v35 = vadd.f32 %v433_v23, %v269_v26 }
 0x16a   :  { %v379_v40 = vpop.permute.xlu1 %378 }
 0x16b   :  { %v434_v17 = vmul.f32 %v2431_v50, %v379_v40 }
 0x16d   :  { %v466_v18 = vadd.f32 %v434_v17, %v270_v43 }
 0x16f   :  { %v219_v14 = vpop.permute.xlu1 %218  ;;  %v662_v33 = vadd.f32 %v630_v22, %v466_v18 }
 0x170   :  { %v272_v42 = vmul.f32 %v2442_v54, %v219_v14 }
 0x171   :  { %v701_v39 = vadd.f32 %v2463_v9, %v662_v33  ;;  %v599_v33 = vpop.permute.xlu0 %598 }
 0x173   :  { %v733_v55 = vmax.f32 %v701_v39, 0.0 }
 0x174   :  { %v387_v21 = vpop.permute.xlu1 %386 }
 0x175   :  { %v436_v15 = vmul.f32 %v2431_v50, %v387_v21  ;;  %v633_v21 = vmul.f32 %v2438_v53, %v587_v56 }
 0x177   :  { %v468_v58 = vadd.f32 %v436_v15, %v272_v42 }
 0x179   :  { %v571_v34 = vpop.permute.xlu1 %570 }
 0x17a   :  { %v629_v37 = vmul.f32 %v2438_v53, %v571_v34 }
 0x17c   :  { %v661_v44 = vadd.f32 %v629_v37, %v465_v35  ;;  %v636_v37 = vmul.f32 %v2438_v53, %v599_v33 }
 0x17d   :  { %v579_v46 = vpop.permute.xlu1 %578 }
 0x17e   :  { %v700_v38 = vadd.f32 %v2463_v9, %v661_v44  ;;  %v631_v51 = vmul.f32 %v2438_v53, %v579_v46 }
 0x180   :  { %v732_v24 = vmax.f32 %v700_v38, 0.0  ;;  %v663_v19 = vadd.f32 %v631_v51, %v467_v4  ;;  %v439_v4 = vmul.f32 %v2431_v50, %v399_v47 }
 0x181   :  { %v583_v52 = vpop.permute.xlu1 %582 }
 0x182   :  { %v752_v30 = vpack.c.bf16 %v733_v55, %v732_v24  ;;  %v632_v28 = vmul.f32 %v2438_v53, %v583_v52  ;;  %v702_v25 = vadd.f32 %v2463_v9, %v663_v19 }
 0x184   :  { %v664_v60 = vadd.f32 %v632_v28, %v468_v58  ;;  %2028 = vmatprep.mubr.msk.bf16.mxu1 %vm795_vm0, %v752_v30  ;;  %v734_v1 = vmax.f32 %v702_v25, 0.0 }
 0x186   :  { %v703_v61 = vadd.f32 %v2463_v9, %v664_v60  ;;  %v229_v63 = vpop.permute.xlu1 %228 }
 0x187   :  { %v274_v59 = vmul.f32 %v2442_v54, %v229_v63 }
 0x188   :  { %v735_v2 = vmax.f32 %v703_v61, 0.0 }
 0x189   :  { %v470_v44 = vadd.f32 %v438_v0, %v274_v59  ;;  %v2129_v0 = vld [vmem:[%s2954_s7 + $0x8] sm:$0xff]  }
 0x18a   :  { %v753_v62 = vpack.c.bf16 %v735_v2, %v734_v1 }
 0x18b   :  { %v391_v36 = vpop.permute.xlu1 %390 }
 0x18c   :  { %2029 = vmatmul.mubr.msk.bf16.gmra.mrb[8].mxu1 %vm795_vm0, %v753_v62  ;;  %v437_v10 = vmul.f32 %v2431_v50, %v391_v36 }
 0x18e   :  { %v469_v18 = vadd.f32 %v437_v10, %v273_v13 }
 0x190   :  { %v234_v32 = vpop.permute.xlu1 %233  ;;  %v665_v16 = vadd.f32 %v633_v21, %v469_v18 }
 0x191   :  { %v275_v46 = vmul.f32 %v2442_v54, %v234_v32 }
 0x192   :  { %v2006_v3 = vpop.f32.mrb[0].mxu0  ;;  %v704_v38 = vadd.f32 %v2463_v9, %v665_v16  ;;  %v2130_v16 = vld [vmem:[%s2954_s7 + $0x50] sm:$0xff]  }
 0x193   :  { %v887_v31 = vadd.f32 %v2006_v3, %v2703_v27  ;;  %v878_v6 = vpop.f32.mrb[1].mxu0  ;;  %v471_v24 = vadd.f32 %v439_v4, %v275_v46  ;;  %v2131_v46 = vld [vmem:[%s2954_s7 + $0x10] sm:$0xff]  }
 0x194   :  { %v879_v49 = vadd.f32 %v2703_v27, %v878_v6  ;;  %v2007_v8 = vpop.f32.mrb[2].mxu0  ;;  %v239_v5 = vpop.permute.xlu1 %238  ;;  %v736_v58 = vmax.f32 %v704_v38, 0.0 }
 0x195   :  { %v890_v29 = vadd.f32 %v2007_v8, %v2703_v27  ;;  %v881_v11 = vpop.f32.mrb[3].mxu0  ;;  %v1007_v40 = vmax.f32 %v887_v31, 0.0  ;;  %v276_v34 = vmul.f32 %v2442_v54, %v239_v5 }
 0x196   :  { %v882_v12 = vadd.f32 %v2703_v27, %v881_v11  ;;  %v1005_v43 = vmax.f32 %v879_v49, 0.0 }
 0x197   :  { %v1008_v14 = vmax.f32 %v890_v29, 0.0 }
 0x198   :  { %v1006_v17 = vmax.f32 %v882_v12, 0.0 }
 0x199   :  { %v1038_v20 = vpack.c.bf16 %v1008_v14, %v1007_v40  ;;  %v403_v22 = vpop.permute.xlu1 %402 }
 0x19a   :  { %v1037_v23 = vpack.c.bf16 %v1006_v17, %v1005_v43  ;;  %v440_v26 = vmul.f32 %v2431_v50, %v403_v22  ;;  %v2126_v22 = vld [vmem:[%s2954_s7 + $0x40] sm:$0xff]  }
 0x19b   :  { %1884 = vmatprep.subr.bf16.mxu0 %v2126_v22 }
 0x19c   :  { %v472_v35 = vadd.f32 %v440_v26, %v276_v34  ;;  %v2128_v26 = vld [vmem:[%s2954_s7 + $0x48] sm:$0xff]  }
 0x19e   :  { %v591_v39 = vpop.permute.xlu1 %590  ;;  %v668_v51 = vadd.f32 %v636_v37, %v472_v35 }
 0x19f   :  { %v634_v15 = vmul.f32 %v2438_v53, %v591_v39 }
 0x1a0   :  { %v707_v30 = vadd.f32 %v2463_v9, %v668_v51  ;;  %v2132_v51 = vld [vmem:[%s2954_s7 + $0x58] sm:$0xff]  }
 0x1a1   :  { %v666_v55 = vadd.f32 %v634_v15, %v470_v44 }
 0x1a2   :  { %v595_v42 = vpop.permute.xlu1 %594  ;;  %v739_v60 = vmax.f32 %v707_v30, 0.0  ;;  %v2135_v30 = vld [vmem:[%s2954_s7 + $0x20] sm:$0xff]  }
 0x1a3   :  { %v705_v19 = vadd.f32 %v2463_v9, %v666_v55  ;;  %v635_v52 = vmul.f32 %v2438_v53, %v595_v42 }
 0x1a5   :  { %v737_v28 = vmax.f32 %v705_v19, 0.0  ;;  %v667_v25 = vadd.f32 %v635_v52, %v471_v24  ;;  %v2133_v52 = vld [vmem:[%s2954_s7 + $0x18] sm:$0xff]  }
 0x1a7   :  { %v754_v50 = vpack.c.bf16 %v737_v28, %v736_v58  ;;  %v706_v54 = vadd.f32 %v2463_v9, %v667_v25  ;;  %v2134_v58 = vld [vmem:[%s2954_s7 + $0x60] sm:$0xff]   ;;  %v2136_v28 = vld [vmem:[%s2954_s7 + $0x68] sm:$0xff]  }
 0x1a8   :  { %v2137_v25 = vld [vmem:[%s2954_s7 + $0x28] sm:$0xff]  }
 0x1a9   :  { %v738_v61 = vmax.f32 %v706_v54, 0.0  ;;  %2032 = vmatprep.mubr.msk.bf16.mxu1 %vm795_vm0, %v754_v50  ;;  %v2138_v50 = vld [vmem:[%s2954_s7 + $0x70] sm:$0xff]  }
 0x1aa   :  { %v2139_v54 = vld [vmem:[%s2954_s7 + $0x30] sm:$0xff]  }
 0x1ab   :  { %v755_v63 = vpack.c.bf16 %v739_v60, %v738_v61  ;;  %v2140_v60 = vld [vmem:[%s2954_s7 + $0x78] sm:$0xff]  }
 0x1ac   :  { %v2141_v61 = vld [vmem:[%s2954_s7 + $0x38] sm:$0xff]  }
 0x1ad   :  { %2033 = vmatmul.mubr.msk.bf16.gmra.mrb[12].mxu1 %vm795_vm0, %v755_v63 }
 0x1ae   :  { %1193 = vmatprep.mubr.bf16.mxu1 %v2195_v7 }
 0x1b3   :  { %v2010_v1 = vpop.f32.mrb[4].mxu0 }
 0x1b4   :  { %v903_v53 = vadd.f32 %v2010_v1, %v2703_v27  ;;  %v894_v2 = vpop.f32.mrb[5].mxu0 }
 0x1b5   :  { %v895_v62 = vadd.f32 %v2703_v27, %v894_v2  ;;  %v2011_v57 = vpop.f32.mrb[6].mxu0  ;;  %1194 = vmatmul.mubr.bf16.vlgmr.msra.gmra.mrb[16].mxu1 %v1037_v23  ;;  %v2127_v23 = vld [vmem:[%s2954_s7] sm:$0xff]  }
 0x1b6   :  { %v906_v36 = vadd.f32 %v2011_v57, %v2703_v27  ;;  %v897_v9 = vpop.f32.mrb[7].mxu0  ;;  %1203 = vmatprep.mubr.bf16.mxu1 %v2195_v7  ;;  %v1011_v32 = vmax.f32 %v903_v53, 0.0  ;;  %1885 = vmatpush3.bf16.msra.mxu0 %v2127_v23 }
 0x1b7   :  { %v898_v47 = vadd.f32 %v2703_v27, %v897_v9  ;;  %v1009_v31 = vmax.f32 %v895_v62, 0.0  ;;  %1886 = vmatprep.subr.bf16.mxu0 %v2128_v26 }
 0x1b8   :  { %v1012_v3 = vmax.f32 %v906_v36, 0.0 }
 0x1b9   :  { %v1010_v6 = vmax.f32 %v898_v47, 0.0 }
 0x1ba   :  { %v1040_v49 = vpack.c.bf16 %v1012_v3, %v1011_v32  ;;  %1887 = vmatpush3.bf16.msra.mxu0 %v2129_v0 }
 0x1bb   :  { %v1039_v8 = vpack.c.bf16 %v1010_v6, %v1009_v31  ;;  %1888 = vmatprep.subr.bf16.mxu0 %v2130_v16 }
 0x1bd   :  { %1204 = vmatmul.mubr.bf16.gmra.mrb[20].mxu1 %v1038_v20 }
 0x1be   :  { %1213 = vmatprep.mubr.bf16.mxu1 %v2195_v7  ;;  %1889 = vmatpush3.bf16.msra.mxu0 %v2131_v46 }
 0x1bf   :  { %1890 = vmatprep.subr.bf16.mxu0 %v2132_v51 }
 0x1c2   :  { %1891 = vmatpush3.bf16.msra.mxu0 %v2133_v52 }
 0x1c3   :  { %1892 = vmatprep.subr.bf16.mxu0 %v2134_v58 }
 0x1c5   :  { %1214 = vmatmul.mubr.bf16.gmra.mrb[24].mxu1 %v1039_v8 }
 0x1c6   :  { %1223 = vmatprep.mubr.bf16.mxu1 %v2195_v7  ;;  %1893 = vmatpush3.bf16.msra.mxu0 %v2135_v30 }
 0x1c7   :  { %1894 = vmatprep.subr.bf16.mxu0 %v2136_v28 }
 0x1ca   :  { %1895 = vmatpush3.bf16.msra.mxu0 %v2137_v25 }
 0x1cb   :  { %1896 = vmatprep.subr.bf16.mxu0 %v2138_v50 }
 0x1cd   :  { %1224 = vmatmul.mubr.bf16.gmra.mrb[28].mxu1 %v1040_v49 }
 0x1ce   :  { %1233 = vmatprep.mubr.bf16.mxu1 %v2195_v7  ;;  %1897 = vmatpush3.bf16.msra.mxu0 %v2139_v54 }
 0x1cf   :  { %1898 = vmatprep.subr.bf16.mxu0 %v2140_v60 }
 0x1d2   :  { %1899 = vmatpush3.bf16.msra.mxu0 %v2141_v61 }
 0x1d3   :  { %v2014_v5 = vpop.f32.mrb[8].mxu0 }
 0x1d4   :  { %v919_v10 = vadd.f32 %v2014_v5, %v2703_v27  ;;  %v910_v29 = vpop.f32.mrb[9].mxu0 }
 0x1d5   :  { %v911_v11 = vadd.f32 %v2703_v27, %v910_v29  ;;  %v2015_v56 = vpop.f32.mrb[10].mxu0 }
 0x1d6   :  { %v922_v12 = vadd.f32 %v2015_v56, %v2703_v27  ;;  %v913_v13 = vpop.f32.mrb[11].mxu0  ;;  %v1015_v14 = vmax.f32 %v919_v10, 0.0 }
 0x1d7   :  { %v914_v40 = vadd.f32 %v2703_v27, %v913_v13  ;;  %v1013_v17 = vmax.f32 %v911_v11, 0.0 }
 0x1d8   :  { %v1016_v43 = vmax.f32 %v922_v12, 0.0 }
 0x1d9   :  { %v1014_v18 = vmax.f32 %v914_v40, 0.0 }
 0x1da   :  { %v1042_v21 = vpack.c.bf16 %v1016_v43, %v1015_v14 }
 0x1db   :  { %v1041_v20 = vpack.c.bf16 %v1014_v18, %v1013_v17 }
 0x1dd   :  { %1234 = vmatmul.mubr.bf16.gmra.mrb[32].mxu1 %v1041_v20 }
 0x1de   :  { %1243 = vmatprep.mubr.bf16.mxu1 %v2195_v7 }
 0x1e5   :  { %1244 = vmatmul.mubr.bf16.gmra.mrb[36].mxu1 %v1042_v21 }
 0x1e6   :  { %1253 = vmatprep.mubr.bf16.mxu1 %v2195_v7 }
 0x1f4   :  { %v2018_v33 = vpop.f32.mrb[12].mxu0 }
 0x1f5   :  { %v935_v59 = vadd.f32 %v2018_v33, %v2703_v27  ;;  %v926_v34 = vpop.f32.mrb[13].mxu0 }
 0x1f6   :  { %v927_v35 = vadd.f32 %v2703_v27, %v926_v34  ;;  %v2019_v37 = vpop.f32.mrb[14].mxu0 }
 0x1f7   :  { %v938_v39 = vadd.f32 %v2019_v37, %v2703_v27  ;;  %v929_v44 = vpop.f32.mrb[15].mxu0  ;;  %v1019_v15 = vmax.f32 %v935_v59, 0.0 }
 0x1f8   :  { %v930_v4 = vadd.f32 %v2703_v27, %v929_v44  ;;  %v1017_v55 = vmax.f32 %v927_v35, 0.0 }
 0x1f9   :  { %v1020_v38 = vmax.f32 %v938_v39, 0.0 }
 0x1fa   :  { %v1018_v42 = vmax.f32 %v930_v4, 0.0 }
 0x1fb   :  { %v1044_v24 = vpack.c.bf16 %v1020_v38, %v1019_v15 }
 0x1fc   :  { %v1043_v19 = vpack.c.bf16 %v1018_v42, %v1017_v55  ;;  %v1069_v42 = vld [vmem:[%s2953_s6] sm:$0x3] }
 0x1fd   :  { %v2823_v28 = vrot.slane %v1069_v42, %v243_v48  ;;  %v2827_v54 = vrot.slane %v1069_v42, %v407_v45 }
 0x1fe   :  { %1254 = vmatmul.mubr.bf16.gmra.mrb[40].mxu1 %v1043_v19 }
 0x1ff   :  { %1263 = vmatprep.mubr.bf16.mxu1 %v2195_v7 }
 0x206   :  { %1264 = vmatmul.mubr.bf16.gmra.mrb[44].mxu1 %v1044_v24 }
 0x207   :  { %1273 = vmatprep.mubr.bf16.mxu1 %v2195_v7 }
 0x219   :  { %v2022_v63 = vpop.f32.mrb[0].mxu1 }
 0x21a   :  { %v951_v1 = vadd.f32 %v2022_v63, %v2703_v27  ;;  %v942_v53 = vpop.f32.mrb[1].mxu1 }
 0x21b   :  { %v943_v2 = vadd.f32 %v2703_v27, %v942_v53  ;;  %v2023_v62 = vpop.f32.mrb[2].mxu1 }
 0x21c   :  { %v954_v57 = vadd.f32 %v2023_v62, %v2703_v27  ;;  %v945_v36 = vpop.f32.mrb[3].mxu1  ;;  %v1023_v47 = vmax.f32 %v951_v1, 0.0 }
 0x21d   :  { %v946_v9 = vadd.f32 %v2703_v27, %v945_v36  ;;  %v1021_v3 = vmax.f32 %v943_v2, 0.0 }
 0x21e   :  { %v1024_v32 = vmax.f32 %v954_v57, 0.0 }
 0x21f   :  { %v1022_v31 = vmax.f32 %v946_v9, 0.0 }
 0x220   :  { %v1046_v6 = vpack.c.bf16 %v1024_v32, %v1023_v47 }
 0x221   :  { %v1045_v49 = vpack.c.bf16 %v1022_v31, %v1021_v3 }
 0x223   :  { %1274 = vmatmul.mubr.bf16.gmra.mrb[48].mxu1 %v1045_v49 }
 0x224   :  { %1283 = vmatprep.mubr.bf16.mxu1 %v2195_v7 }
 0x22b   :  { %1284 = vmatmul.mubr.bf16.gmra.mrb[52].mxu1 %v1046_v6 }
 0x22c   :  { %1293 = vmatprep.mubr.bf16.mxu1 %v2195_v7 }
 0x23a   :  { %v2026_v8 = vpop.f32.mrb[4].mxu1 }
 0x23b   :  { %v967_v5 = vadd.f32 %v2026_v8, %v2703_v27  ;;  %v958_v10 = vpop.f32.mrb[5].mxu1 }
 0x23c   :  { %v959_v29 = vadd.f32 %v2703_v27, %v958_v10  ;;  %v2027_v11 = vpop.f32.mrb[6].mxu1 }
 0x23d   :  { %v970_v56 = vadd.f32 %v2027_v11, %v2703_v27  ;;  %v961_v12 = vpop.f32.mrb[7].mxu1  ;;  %v1027_v40 = vmax.f32 %v967_v5, 0.0 }
 0x23e   :  { %v962_v13 = vadd.f32 %v2703_v27, %v961_v12  ;;  %v1025_v43 = vmax.f32 %v959_v29, 0.0 }
 0x23f   :  { %v1028_v14 = vmax.f32 %v970_v56, 0.0 }
 0x240   :  { %v1026_v17 = vmax.f32 %v962_v13, 0.0 }
 0x241   :  { %v1048_v18 = vpack.c.bf16 %v1028_v14, %v1027_v40 }
 0x242   :  { %v1047_v21 = vpack.c.bf16 %v1026_v17, %v1025_v43 }
 0x244   :  { %1294 = vmatmul.mubr.bf16.gmra.mrb[56].mxu1 %v1047_v21 }
 0x245   :  { %1303 = vmatprep.mubr.bf16.mxu1 %v2195_v7 }
 0x24c   :  { %1304 = vmatmul.mubr.bf16.gmra.mrb[60].mxu1 %v1048_v18 }
 0x24d   :  { %1313 = vmatprep.mubr.bf16.mxu1 %v2195_v7 }
 0x25f   :  { %v2030_v20 = vpop.f32.mrb[8].mxu1 }
 0x260   :  { %v983_v22 = vadd.f32 %v2030_v20, %v2703_v27  ;;  %v974_v23 = vpop.f32.mrb[9].mxu1 }
 0x261   :  { %v975_v26 = vadd.f32 %v2703_v27, %v974_v23  ;;  %v2031_v33 = vpop.f32.mrb[10].mxu1 }
 0x262   :  { %v986_v0 = vadd.f32 %v2031_v33, %v2703_v27  ;;  %v977_v59 = vpop.f32.mrb[11].mxu1  ;;  %v1031_v16 = vmax.f32 %v983_v22, 0.0 }
 0x263   :  { %v978_v34 = vadd.f32 %v2703_v27, %v977_v59  ;;  %v1029_v37 = vmax.f32 %v975_v26, 0.0 }
 0x264   :  { %v1032_v35 = vmax.f32 %v986_v0, 0.0 }
 0x265   :  { %v1030_v39 = vmax.f32 %v978_v34, 0.0 }
 0x266   :  { %v1050_v44 = vpack.c.bf16 %v1032_v35, %v1031_v16 }
 0x267   :  { %v1049_v4 = vpack.c.bf16 %v1030_v39, %v1029_v37 }
 0x269   :  { %1314 = vmatmul.mubr.bf16.gmra.mrb[64].mxu1 %v1049_v4 }
 0x26a   :  { %1323 = vmatprep.mubr.bf16.mxu1 %v2195_v7 }
 0x271   :  { %1324 = vmatmul.mubr.bf16.gmra.mrb[68].mxu1 %v1050_v44 }
 0x272   :  { %1333 = vmatprep.mubr.bf16.mxu1 %v2195_v7 }
 0x280   :  { %v2034_v46 = vpop.f32.mrb[12].mxu1 }
 0x281   :  { %v999_v15 = vadd.f32 %v2034_v46, %v2703_v27  ;;  %v990_v38 = vpop.f32.mrb[13].mxu1 }
 0x282   :  { %v991_v51 = vadd.f32 %v2703_v27, %v990_v38  ;;  %v2035_v55 = vpop.f32.mrb[14].mxu1 }
 0x283   :  { %v1002_v24 = vadd.f32 %v2035_v55, %v2703_v27  ;;  %v993_v19 = vpop.f32.mrb[15].mxu1  ;;  %v1035_v58 = vmax.f32 %v999_v15, 0.0 }
 0x284   :  { %v994_v52 = vadd.f32 %v2703_v27, %v993_v19  ;;  %v1033_v25 = vmax.f32 %v991_v51, 0.0 }
 0x285   :  { %v1036_v30 = vmax.f32 %v1002_v24, 0.0 }
 0x286   :  { %v1034_v50 = vmax.f32 %v994_v52, 0.0 }
 0x287   :  { %v1052_v60 = vpack.c.bf16 %v1036_v30, %v1035_v58 }
 0x288   :  { %v1051_v61 = vpack.c.bf16 %v1034_v50, %v1033_v25  ;;  %v1195_v63 = vpop.f32.mrb[16].mxu1 }
 0x289   :  { %v1196_v1 = vadd.f32 %v1195_v63, %v2823_v28  ;;  %v1197_v53 = vpop.f32.mrb[17].mxu1 }
 0x28a   :  { %v1198_v27 = vadd.f32 %v1197_v53, %v2827_v54  ;;  %v1199_v2 = vpop.f32.mrb[18].mxu1  ;;  %1334 = vmatmul.mubr.bf16.gmra.mrb[72].mxu1 %v1051_v61 }
 0x28b   :  { %v1200_v62 = vadd.f32 %v1199_v2, %v2823_v28  ;;  %v1201_v48 = vpop.f32.mrb[19].mxu1  ;;  %1343 = vmatprep.mubr.bf16.mxu1 %v2195_v7  ;;  %v1354_v41 = vmax.f32 %v1196_v1, 0.0 }
 0x28c   :  { %v1202_v57 = vadd.f32 %v1201_v48, %v2827_v54  ;;  %v1355_v36 = vmax.f32 %v1198_v27, 0.0 }
 0x28d   :  { %v1356_v45 = vmax.f32 %v1200_v62, 0.0 }
 0x28e   :  { %v1357_v9 = vmax.f32 %v1202_v57, 0.0 }
 0x28f   :  { %v1418_v47 = vpack.c.bf16 %v1356_v45, %v1354_v41 }
 0x290   :  { %v1419_v32 = vpack.c.bf16 %v1357_v9, %v1355_v36  ;;  %v1205_v3 = vpop.f32.mrb[20].mxu1 }
 0x291   :  { %v1206_v31 = vadd.f32 %v1205_v3, %v2823_v28  ;;  %v1207_v6 = vpop.f32.mrb[21].mxu1 }
 0x292   :  { %v1208_v49 = vadd.f32 %v1207_v6, %v2827_v54  ;;  %v1209_v8 = vpop.f32.mrb[22].mxu1  ;;  %1344 = vmatmul.mubr.bf16.gmra.mrb[76].mxu1 %v1052_v60  ;;  %1617 = vmatprep.mubr.bf16.mxu0 %v1419_v32 }
 0x293   :  { %v1210_v5 = vadd.f32 %v1209_v8, %v2823_v28  ;;  %v1211_v7 = vpop.f32.mrb[23].mxu1  ;;  %1618 = vmatmul.mubr.bf16.vlgmr.msra.gmra.mrb[16].mxu0 %v1418_v47  ;;  %v1358_v29 = vmax.f32 %v1206_v31, 0.0 }
 0x294   :  { %v1212_v10 = vadd.f32 %v1211_v7, %v2827_v54  ;;  %v1359_v56 = vmax.f32 %v1208_v49, 0.0 }
 0x295   :  { %v1360_v11 = vmax.f32 %v1210_v5, 0.0 }
 0x296   :  { %v1361_v12 = vmax.f32 %v1212_v10, 0.0 }
 0x297   :  { %v1420_v13 = vpack.c.bf16 %v1360_v11, %v1358_v29 }
 0x298   :  { %v1421_v40 = vpack.c.bf16 %v1361_v12, %v1359_v56  ;;  %v1215_v14 = vpop.f32.mrb[24].mxu1 }
 0x299   :  { %v1216_v43 = vadd.f32 %v1215_v14, %v2823_v28  ;;  %v1217_v17 = vpop.f32.mrb[25].mxu1 }
 0x29a   :  { %v1218_v18 = vadd.f32 %v1217_v17, %v2827_v54  ;;  %v1219_v21 = vpop.f32.mrb[26].mxu1  ;;  %1625 = vmatprep.mubr.bf16.mxu0 %v1421_v40 }
 0x29b   :  { %v1220_v20 = vadd.f32 %v1219_v21, %v2823_v28  ;;  %v1221_v22 = vpop.f32.mrb[27].mxu1  ;;  %1626 = vmatmul.mubr.bf16.gmra.mrb[20].mxu0 %v1420_v13  ;;  %v1362_v26 = vmax.f32 %v1216_v43, 0.0 }
 0x29c   :  { %v1222_v23 = vadd.f32 %v1221_v22, %v2827_v54  ;;  %v1363_v0 = vmax.f32 %v1218_v18, 0.0 }
 0x29d   :  { %v1364_v33 = vmax.f32 %v1220_v20, 0.0 }
 0x29e   :  { %v1365_v59 = vmax.f32 %v1222_v23, 0.0 }
 0x29f   :  { %v1422_v34 = vpack.c.bf16 %v1364_v33, %v1362_v26 }
 0x2a0   :  { %v1423_v16 = vpack.c.bf16 %v1365_v59, %v1363_v0  ;;  %v1225_v35 = vpop.f32.mrb[28].mxu1 }
 0x2a1   :  { %v1226_v37 = vadd.f32 %v1225_v35, %v2823_v28  ;;  %v1227_v39 = vpop.f32.mrb[29].mxu1 }
 0x2a2   :  { %v1228_v44 = vadd.f32 %v1227_v39, %v2827_v54  ;;  %v1229_v4 = vpop.f32.mrb[30].mxu1  ;;  %1633 = vmatprep.mubr.bf16.mxu0 %v1423_v16 }
 0x2a3   :  { %v1230_v46 = vadd.f32 %v1229_v4, %v2823_v28  ;;  %v1231_v15 = vpop.f32.mrb[31].mxu1  ;;  %1634 = vmatmul.mubr.bf16.gmra.mrb[24].mxu0 %v1422_v34  ;;  %v1366_v51 = vmax.f32 %v1226_v37, 0.0 }
 0x2a4   :  { %v1232_v38 = vadd.f32 %v1231_v15, %v2827_v54  ;;  %v1367_v42 = vmax.f32 %v1228_v44, 0.0 }
 0x2a5   :  { %v1368_v55 = vmax.f32 %v1230_v46, 0.0 }
 0x2a6   :  { %v1369_v24 = vmax.f32 %v1232_v38, 0.0 }
 0x2a7   :  { %v1424_v19 = vpack.c.bf16 %v1368_v55, %v1366_v51 }
 0x2a8   :  { %v1425_v52 = vpack.c.bf16 %v1369_v24, %v1367_v42 }
 0x2aa   :  { %1641 = vmatprep.mubr.bf16.mxu0 %v1425_v52 }
 0x2ab   :  { %1642 = vmatmul.mubr.bf16.gmra.mrb[28].mxu0 %v1424_v19 }
 0x2b0   :  { %v1235_v58 = vpop.f32.mrb[32].mxu1 }
 0x2b1   :  { %v1236_v30 = vadd.f32 %v1235_v58, %v2823_v28  ;;  %v1237_v25 = vpop.f32.mrb[33].mxu1 }
 0x2b2   :  { %v1238_v50 = vadd.f32 %v1237_v25, %v2827_v54  ;;  %v1239_v60 = vpop.f32.mrb[34].mxu1 }
 0x2b3   :  { %v1240_v61 = vadd.f32 %v1239_v60, %v2823_v28  ;;  %v1241_v63 = vpop.f32.mrb[35].mxu1  ;;  %v1370_v53 = vmax.f32 %v1236_v30, 0.0 }
 0x2b4   :  { %v1242_v1 = vadd.f32 %v1241_v63, %v2827_v54  ;;  %v1371_v2 = vmax.f32 %v1238_v50, 0.0 }
 0x2b5   :  { %v1372_v27 = vmax.f32 %v1240_v61, 0.0 }
 0x2b6   :  { %v1373_v62 = vmax.f32 %v1242_v1, 0.0 }
 0x2b7   :  { %v1426_v48 = vpack.c.bf16 %v1372_v27, %v1370_v53 }
 0x2b8   :  { %v1427_v57 = vpack.c.bf16 %v1373_v62, %v1371_v2  ;;  %v1245_v41 = vpop.f32.mrb[36].mxu1 }
 0x2b9   :  { %v1246_v45 = vadd.f32 %v1245_v41, %v2823_v28  ;;  %v1247_v36 = vpop.f32.mrb[37].mxu1 }
 0x2ba   :  { %v1248_v9 = vadd.f32 %v1247_v36, %v2827_v54  ;;  %v1249_v47 = vpop.f32.mrb[38].mxu1  ;;  %1649 = vmatprep.mubr.bf16.mxu0 %v1427_v57 }
 0x2bb   :  { %v1250_v32 = vadd.f32 %v1249_v47, %v2823_v28  ;;  %v1251_v3 = vpop.f32.mrb[39].mxu1  ;;  %1650 = vmatmul.mubr.bf16.gmra.mrb[32].mxu0 %v1426_v48  ;;  %v1374_v6 = vmax.f32 %v1246_v45, 0.0 }
 0x2bc   :  { %v1252_v31 = vadd.f32 %v1251_v3, %v2827_v54  ;;  %v1375_v8 = vmax.f32 %v1248_v9, 0.0 }
 0x2bd   :  { %v1376_v49 = vmax.f32 %v1250_v32, 0.0 }
 0x2be   :  { %v1377_v5 = vmax.f32 %v1252_v31, 0.0 }
 0x2bf   :  { %v1428_v7 = vpack.c.bf16 %v1376_v49, %v1374_v6 }
 0x2c0   :  { %v1429_v10 = vpack.c.bf16 %v1377_v5, %v1375_v8 }
 0x2c2   :  { %1657 = vmatprep.mubr.bf16.mxu0 %v1429_v10 }
 0x2c3   :  { %1658 = vmatmul.mubr.bf16.gmra.mrb[36].mxu0 %v1428_v7 }
 0x2d1   :  { %v1255_v29 = vpop.f32.mrb[40].mxu1 }
 0x2d2   :  { %v1256_v11 = vadd.f32 %v1255_v29, %v2823_v28  ;;  %v1257_v56 = vpop.f32.mrb[41].mxu1 }
 0x2d3   :  { %v1258_v12 = vadd.f32 %v1257_v56, %v2827_v54  ;;  %v1259_v13 = vpop.f32.mrb[42].mxu1 }
 0x2d4   :  { %v1260_v40 = vadd.f32 %v1259_v13, %v2823_v28  ;;  %v1261_v14 = vpop.f32.mrb[43].mxu1  ;;  %v1378_v17 = vmax.f32 %v1256_v11, 0.0 }
 0x2d5   :  { %v1262_v43 = vadd.f32 %v1261_v14, %v2827_v54  ;;  %v1379_v21 = vmax.f32 %v1258_v12, 0.0 }
 0x2d6   :  { %v1380_v18 = vmax.f32 %v1260_v40, 0.0 }
 0x2d7   :  { %v1381_v20 = vmax.f32 %v1262_v43, 0.0 }
 0x2d8   :  { %v1430_v22 = vpack.c.bf16 %v1380_v18, %v1378_v17 }
 0x2d9   :  { %v1431_v23 = vpack.c.bf16 %v1381_v20, %v1379_v21  ;;  %v1265_v26 = vpop.f32.mrb[44].mxu1 }
 0x2da   :  { %v1266_v33 = vadd.f32 %v1265_v26, %v2823_v28  ;;  %v1267_v0 = vpop.f32.mrb[45].mxu1 }
 0x2db   :  { %v1268_v59 = vadd.f32 %v1267_v0, %v2827_v54  ;;  %v1269_v34 = vpop.f32.mrb[46].mxu1  ;;  %1665 = vmatprep.mubr.bf16.mxu0 %v1431_v23 }
 0x2dc   :  { %v1270_v16 = vadd.f32 %v1269_v34, %v2823_v28  ;;  %v1271_v35 = vpop.f32.mrb[47].mxu1  ;;  %1666 = vmatmul.mubr.bf16.gmra.mrb[40].mxu0 %v1430_v22  ;;  %v1382_v39 = vmax.f32 %v1266_v33, 0.0 }
 0x2dd   :  { %v1272_v37 = vadd.f32 %v1271_v35, %v2827_v54  ;;  %v1383_v4 = vmax.f32 %v1268_v59, 0.0 }
 0x2de   :  { %v1384_v44 = vmax.f32 %v1270_v16, 0.0 }
 0x2df   :  { %v1385_v46 = vmax.f32 %v1272_v37, 0.0 }
 0x2e0   :  { %v1432_v15 = vpack.c.bf16 %v1384_v44, %v1382_v39 }
 0x2e1   :  { %v1433_v38 = vpack.c.bf16 %v1385_v46, %v1383_v4 }
 0x2e3   :  { %1673 = vmatprep.mubr.bf16.mxu0 %v1433_v38 }
 0x2e4   :  { %1674 = vmatmul.mubr.bf16.gmra.mrb[44].mxu0 %v1432_v15 }
 0x2f6   :  { %v1275_v51 = vpop.f32.mrb[48].mxu1 }
 0x2f7   :  { %v1276_v55 = vadd.f32 %v1275_v51, %v2823_v28  ;;  %v1277_v42 = vpop.f32.mrb[49].mxu1 }
 0x2f8   :  { %v1278_v24 = vadd.f32 %v1277_v42, %v2827_v54  ;;  %v1279_v19 = vpop.f32.mrb[50].mxu1 }
 0x2f9   :  { %v1280_v52 = vadd.f32 %v1279_v19, %v2823_v28  ;;  %v1281_v58 = vpop.f32.mrb[51].mxu1  ;;  %v1386_v25 = vmax.f32 %v1276_v55, 0.0 }
 0x2fa   :  { %v1282_v30 = vadd.f32 %v1281_v58, %v2827_v54  ;;  %v1387_v60 = vmax.f32 %v1278_v24, 0.0 }
 0x2fb   :  { %v1388_v50 = vmax.f32 %v1280_v52, 0.0 }
 0x2fc   :  { %v1389_v61 = vmax.f32 %v1282_v30, 0.0 }
 0x2fd   :  { %v1434_v63 = vpack.c.bf16 %v1388_v50, %v1386_v25 }
 0x2fe   :  { %v1435_v1 = vpack.c.bf16 %v1389_v61, %v1387_v60  ;;  %v1285_v53 = vpop.f32.mrb[52].mxu1 }
 0x2ff   :  { %v1286_v27 = vadd.f32 %v1285_v53, %v2823_v28  ;;  %v1287_v2 = vpop.f32.mrb[53].mxu1 }
 0x300   :  { %v1288_v62 = vadd.f32 %v1287_v2, %v2827_v54  ;;  %v1289_v48 = vpop.f32.mrb[54].mxu1  ;;  %1681 = vmatprep.mubr.bf16.mxu0 %v1435_v1 }
 0x301   :  { %v1290_v57 = vadd.f32 %v1289_v48, %v2823_v28  ;;  %v1291_v41 = vpop.f32.mrb[55].mxu1  ;;  %1682 = vmatmul.mubr.bf16.gmra.mrb[48].mxu0 %v1434_v63  ;;  %v1390_v36 = vmax.f32 %v1286_v27, 0.0 }
 0x302   :  { %v1292_v45 = vadd.f32 %v1291_v41, %v2827_v54  ;;  %v1391_v47 = vmax.f32 %v1288_v62, 0.0 }
 0x303   :  { %v1392_v9 = vmax.f32 %v1290_v57, 0.0 }
 0x304   :  { %v1393_v32 = vmax.f32 %v1292_v45, 0.0 }
 0x305   :  { %v1436_v3 = vpack.c.bf16 %v1392_v9, %v1390_v36 }
 0x306   :  { %v1437_v31 = vpack.c.bf16 %v1393_v32, %v1391_v47 }
 0x308   :  { %1689 = vmatprep.mubr.bf16.mxu0 %v1437_v31 }
 0x309   :  { %1690 = vmatmul.mubr.bf16.gmra.mrb[52].mxu0 %v1436_v3 }
 0x317   :  { %v1295_v6 = vpop.f32.mrb[56].mxu1 }
 0x318   :  { %v1296_v49 = vadd.f32 %v1295_v6, %v2823_v28  ;;  %v1297_v8 = vpop.f32.mrb[57].mxu1 }
 0x319   :  { %v1298_v5 = vadd.f32 %v1297_v8, %v2827_v54  ;;  %v1299_v7 = vpop.f32.mrb[58].mxu1 }
 0x31a   :  { %v1300_v10 = vadd.f32 %v1299_v7, %v2823_v28  ;;  %v1301_v29 = vpop.f32.mrb[59].mxu1  ;;  %v1394_v56 = vmax.f32 %v1296_v49, 0.0 }
 0x31b   :  { %v1302_v11 = vadd.f32 %v1301_v29, %v2827_v54  ;;  %v1395_v13 = vmax.f32 %v1298_v5, 0.0 }
 0x31c   :  { %v1396_v12 = vmax.f32 %v1300_v10, 0.0 }
 0x31d   :  { %v1397_v40 = vmax.f32 %v1302_v11, 0.0 }
 0x31e   :  { %v1438_v14 = vpack.c.bf16 %v1396_v12, %v1394_v56 }
 0x31f   :  { %v1439_v43 = vpack.c.bf16 %v1397_v40, %v1395_v13  ;;  %v1305_v17 = vpop.f32.mrb[60].mxu1 }
 0x320   :  { %v1306_v18 = vadd.f32 %v1305_v17, %v2823_v28  ;;  %v1307_v21 = vpop.f32.mrb[61].mxu1 }
 0x321   :  { %v1308_v20 = vadd.f32 %v1307_v21, %v2827_v54  ;;  %v1309_v22 = vpop.f32.mrb[62].mxu1  ;;  %1697 = vmatprep.mubr.bf16.mxu0 %v1439_v43 }
 0x322   :  { %v1310_v23 = vadd.f32 %v1309_v22, %v2823_v28  ;;  %v1311_v26 = vpop.f32.mrb[63].mxu1  ;;  %1698 = vmatmul.mubr.bf16.gmra.mrb[56].mxu0 %v1438_v14  ;;  %v1398_v0 = vmax.f32 %v1306_v18, 0.0 }
 0x323   :  { %v1312_v33 = vadd.f32 %v1311_v26, %v2827_v54  ;;  %v1399_v34 = vmax.f32 %v1308_v20, 0.0 }
 0x324   :  { %v1400_v59 = vmax.f32 %v1310_v23, 0.0 }
 0x325   :  { %v1401_v16 = vmax.f32 %v1312_v33, 0.0 }
 0x326   :  { %v1440_v35 = vpack.c.bf16 %v1400_v59, %v1398_v0 }
 0x327   :  { %v1441_v37 = vpack.c.bf16 %v1401_v16, %v1399_v34 }
 0x329   :  { %1705 = vmatprep.mubr.bf16.mxu0 %v1441_v37 }
 0x32a   :  { %1706 = vmatmul.mubr.bf16.gmra.mrb[60].mxu0 %v1440_v35 }
 0x33c   :  { %v1315_v39 = vpop.f32.mrb[64].mxu1 }
 0x33d   :  { %v1316_v44 = vadd.f32 %v1315_v39, %v2823_v28  ;;  %v1317_v4 = vpop.f32.mrb[65].mxu1 }
 0x33e   :  { %v1318_v46 = vadd.f32 %v1317_v4, %v2827_v54  ;;  %v1319_v15 = vpop.f32.mrb[66].mxu1 }
 0x33f   :  { %v1320_v38 = vadd.f32 %v1319_v15, %v2823_v28  ;;  %v1321_v51 = vpop.f32.mrb[67].mxu1  ;;  %v1402_v42 = vmax.f32 %v1316_v44, 0.0  ;;  %v2897_v44 = vld [vmem:[%s2955_s8] ss:$0 sm:$0xff]  ;;  %s2196_s8 = smov [#allocation5]  }
 0x340   :  { %v1322_v55 = vadd.f32 %v1321_v51, %v2827_v54  ;;  %v1403_v19 = vmax.f32 %v1318_v46, 0.0  ;;  %s1800_s14 = sshll.u32 %s2196_s8, 4  ;;  %s1801_s14 = int_to_ptr.vmem [resolvable:$true] %s1800_s14 }
 0x341   :  { %v1404_v24 = vmax.f32 %v1320_v38, 0.0  ;;  %s2164_s15 = scalar_lea.vmem %s1801_s14, 32  ;;  %p2169_p9 = scmp.lt.s32.totalorder %s1801_s14, %s1801_s14 }
 0x342   :  { %v1405_v52 = vmax.f32 %v1322_v55, 0.0  ;;  %p2165_p8 = scmp.ne.s32.totalorder %s1801_s14, %s2164_s15  ;;  %p2170_p10 = scmp.lt.s32.totalorder %s2164_s15, %s2164_s15 }
 0x343   :  { %v1442_v58 = vpack.c.bf16 %v1404_v24, %v1402_v42 }
 0x344   :  { %v1443_v30 = vpack.c.bf16 %v1405_v52, %v1403_v19  ;;  %v1325_v25 = vpop.f32.mrb[68].mxu1  ;;  %p2171_p11 = por %p2170_p10, %p2169_p9 }
 0x345   :  { %v1326_v50 = vadd.f32 %v1325_v25, %v2823_v28  ;;  %v1327_v60 = vpop.f32.mrb[69].mxu1 }
 0x346   :  { %v1328_v61 = vadd.f32 %v1327_v60, %v2827_v54  ;;  %v1329_v63 = vpop.f32.mrb[70].mxu1  ;;  %1713 = vmatprep.mubr.bf16.mxu0 %v1443_v30  ;;  %p2172_p12 = pnand %p2171_p11, %p2165_p8 }
 0x347   :  { %v1330_v1 = vadd.f32 %v1329_v63, %v2823_v28  ;;  %v1331_v53 = vpop.f32.mrb[71].mxu1  ;;  %1714 = vmatmul.mubr.bf16.gmra.mrb[64].mxu0 %v1442_v58  ;;  %v1406_v2 = vmax.f32 %v1326_v50, 0.0 }
 0x348   :  { %v1332_v27 = vadd.f32 %v1331_v53, %v2827_v54  ;;  %v1407_v48 = vmax.f32 %v1328_v61, 0.0 }
 0x349   :  { %v1408_v62 = vmax.f32 %v1330_v1, 0.0 }
 0x34a   :  { %v1409_v57 = vmax.f32 %v1332_v27, 0.0 }
 0x34b   :  { %v1444_v41 = vpack.c.bf16 %v1408_v62, %v1406_v2 }
 0x34c   :  { %v1445_v45 = vpack.c.bf16 %v1409_v57, %v1407_v48 }
 0x34e   :  { %1721 = vmatprep.mubr.bf16.mxu0 %v1445_v45 }
 0x34f   :  { %1722 = vmatmul.mubr.bf16.gmra.mrb[68].mxu0 %v1444_v41 }
 0x35d   :  { %v1335_v36 = vpop.f32.mrb[72].mxu1 }
 0x35e   :  { %v1336_v9 = vadd.f32 %v1335_v36, %v2823_v28  ;;  %v1337_v47 = vpop.f32.mrb[73].mxu1 }
 0x35f   :  { %v1338_v32 = vadd.f32 %v1337_v47, %v2827_v54  ;;  %v1339_v3 = vpop.f32.mrb[74].mxu1 }
 0x360   :  { %v1340_v31 = vadd.f32 %v1339_v3, %v2823_v28  ;;  %v1341_v6 = vpop.f32.mrb[75].mxu1  ;;  %v1410_v8 = vmax.f32 %v1336_v9, 0.0 }
 0x361   :  { %v1342_v49 = vadd.f32 %v1341_v6, %v2827_v54  ;;  %v1411_v7 = vmax.f32 %v1338_v32, 0.0 }
 0x362   :  { %v1412_v5 = vmax.f32 %v1340_v31, 0.0 }
 0x363   :  { %v1413_v10 = vmax.f32 %v1342_v49, 0.0 }
 0x364   :  { %v1446_v29 = vpack.c.bf16 %v1412_v5, %v1410_v8 }
 0x365   :  { %v1447_v11 = vpack.c.bf16 %v1413_v10, %v1411_v7  ;;  %v1345_v56 = vpop.f32.mrb[76].mxu1 }
 0x366   :  { %v1346_v12 = vadd.f32 %v1345_v56, %v2823_v28  ;;  %v1347_v13 = vpop.f32.mrb[77].mxu1  ;;  %v1900_v40 = vpop.f32.mrb[16].mxu0 }
 0x367   :  { %v1348_v14 = vadd.f32 %v1347_v13, %v2827_v54  ;;  %v1349_v43 = vpop.f32.mrb[78].mxu1  ;;  %v1901_v17 = vpop.f32.mrb[17].mxu0  ;;  %1729 = vmatprep.mubr.bf16.mxu0 %v1447_v11 }
 0x368   :  { %v1350_v18 = vadd.f32 %v1349_v43, %v2823_v28  ;;  %v1902_v21 = vadd.f32 %v1901_v17, %v1900_v40  ;;  %v1351_v20 = vpop.f32.mrb[79].mxu1  ;;  %v1903_v22 = vpop.f32.mrb[18].mxu0  ;;  %1730 = vmatmul.mubr.bf16.gmra.mrb[72].mxu0 %v1446_v29  ;;  %v1414_v33 = vmax.f32 %v1346_v12, 0.0 }
 0x369   :  { %v1352_v23 = vadd.f32 %v1351_v20, %v2827_v54  ;;  %v1904_v26 = vpop.f32.mrb[19].mxu0  ;;  %v1415_v34 = vmax.f32 %v1348_v14, 0.0 }
 0x36a   :  { %v1416_v0 = vmax.f32 %v1350_v18, 0.0  ;;  %v1905_v59 = vadd.f32 %v1904_v26, %v1903_v22  ;;  %v1620_v15 = vadd.f32 %v1902_v21, %v2897_v44 }
 0x36b   :  { %v1417_v16 = vmax.f32 %v1352_v23, 0.0 }
 0x36c   :  { %v1448_v35 = vpack.c.bf16 %v1416_v0, %v1414_v33  ;;  %v1623_v55 = vadd.f32 %v1905_v59, %v2897_v44 }
 0x36d   :  { %v1449_v37 = vpack.c.bf16 %v1417_v16, %v1415_v34 }
 0x36e   :  { %v1906_v39 = vpop.f32.mrb[20].mxu0 }
 0x36f   :  { %v1907_v28 = vpop.f32.mrb[21].mxu0  ;;  %1737 = vmatprep.mubr.bf16.mxu0 %v1449_v37 }
 0x370   :  { %v1908_v4 = vadd.f32 %v1907_v28, %v1906_v39  ;;  %v1909_v46 = vpop.f32.mrb[22].mxu0  ;;  %1738 = vmatmul.mubr.bf16.gmra.mrb[76].mxu0 %v1448_v35 }
 0x371   :  { %v1910_v54 = vpop.f32.mrb[23].mxu0 }
 0x372   :  { %v1628_v38 = vadd.f32 %v1908_v4, %v2897_v44  ;;  %v1911_v51 = vadd.f32 %v1910_v54, %v1909_v46 }
 0x374   :  { %v1746_v42 = vmax.f32 %v1620_v15, %v1628_v38  ;;  %v1631_v24 = vadd.f32 %v1911_v51, %v2897_v44 }
 0x376   :  { %v1747_v19 = vmax.f32 %v1623_v55, %v1631_v24  ;;  %v1912_v52 = vpop.f32.mrb[24].mxu0 }
 0x377   :  { %v1913_v58 = vpop.f32.mrb[25].mxu0 }
 0x378   :  { %v1914_v30 = vadd.f32 %v1913_v58, %v1912_v52  ;;  %v1915_v25 = vpop.f32.mrb[26].mxu0 }
 0x379   :  { %v1916_v50 = vpop.f32.mrb[27].mxu0 }
 0x37a   :  { %v1636_v60 = vadd.f32 %v1914_v30, %v2897_v44  ;;  %v1917_v61 = vadd.f32 %v1916_v50, %v1915_v25 }
 0x37c   :  { %v1748_v63 = vmax.f32 %v1746_v42, %v1636_v60  ;;  %v1639_v1 = vadd.f32 %v1917_v61, %v2897_v44 }
 0x37e   :  { %v1749_v53 = vmax.f32 %v1747_v19, %v1639_v1  ;;  %v1918_v27 = vpop.f32.mrb[28].mxu0 }
 0x37f   :  { %v1919_v2 = vpop.f32.mrb[29].mxu0 }
 0x380   :  { %v1920_v62 = vadd.f32 %v1919_v2, %v1918_v27  ;;  %v1921_v48 = vpop.f32.mrb[30].mxu0 }
 0x381   :  { %v1922_v57 = vpop.f32.mrb[31].mxu0 }
 0x382   :  { %v1644_v41 = vadd.f32 %v1920_v62, %v2897_v44  ;;  %v1923_v45 = vadd.f32 %v1922_v57, %v1921_v48 }
 0x384   :  { %v1750_v36 = vmax.f32 %v1748_v63, %v1644_v41  ;;  %v1647_v9 = vadd.f32 %v1923_v45, %v2897_v44 }
 0x386   :  { %v1751_v47 = vmax.f32 %v1749_v53, %v1647_v9 }
 0x38e   :  { %v1924_v32 = vpop.f32.mrb[32].mxu0 }
 0x38f   :  { %v1925_v3 = vpop.f32.mrb[33].mxu0 }
 0x390   :  { %v1926_v31 = vadd.f32 %v1925_v3, %v1924_v32  ;;  %v1927_v6 = vpop.f32.mrb[34].mxu0 }
 0x391   :  { %v1928_v49 = vpop.f32.mrb[35].mxu0 }
 0x392   :  { %v1652_v8 = vadd.f32 %v1926_v31, %v2897_v44  ;;  %v1929_v5 = vadd.f32 %v1928_v49, %v1927_v6 }
 0x394   :  { %v1752_v7 = vmax.f32 %v1750_v36, %v1652_v8  ;;  %v1655_v10 = vadd.f32 %v1929_v5, %v2897_v44 }
 0x396   :  { %v1753_v29 = vmax.f32 %v1751_v47, %v1655_v10  ;;  %v1930_v11 = vpop.f32.mrb[36].mxu0 }
 0x397   :  { %v1931_v56 = vpop.f32.mrb[37].mxu0 }
 0x398   :  { %v1932_v12 = vadd.f32 %v1931_v56, %v1930_v11  ;;  %v1933_v13 = vpop.f32.mrb[38].mxu0 }
 0x399   :  { %v1934_v40 = vpop.f32.mrb[39].mxu0 }
 0x39a   :  { %v1660_v14 = vadd.f32 %v1932_v12, %v2897_v44  ;;  %v1935_v43 = vadd.f32 %v1934_v40, %v1933_v13 }
 0x39c   :  { %v1754_v17 = vmax.f32 %v1752_v7, %v1660_v14  ;;  %v1663_v18 = vadd.f32 %v1935_v43, %v2897_v44 }
 0x39e   :  { %v1755_v21 = vmax.f32 %v1753_v29, %v1663_v18 }
 0x3af   :  { %v1936_v20 = vpop.f32.mrb[40].mxu0 }
 0x3b0   :  { %v1937_v22 = vpop.f32.mrb[41].mxu0 }
 0x3b1   :  { %v1938_v23 = vadd.f32 %v1937_v22, %v1936_v20  ;;  %v1939_v26 = vpop.f32.mrb[42].mxu0 }
 0x3b2   :  { %v1940_v33 = vpop.f32.mrb[43].mxu0 }
 0x3b3   :  { %v1668_v0 = vadd.f32 %v1938_v23, %v2897_v44  ;;  %v1941_v59 = vadd.f32 %v1940_v33, %v1939_v26 }
 0x3b5   :  { %v1756_v34 = vmax.f32 %v1754_v17, %v1668_v0  ;;  %v1671_v16 = vadd.f32 %v1941_v59, %v2897_v44 }
 0x3b7   :  { %v1757_v35 = vmax.f32 %v1755_v21, %v1671_v16  ;;  %v1942_v37 = vpop.f32.mrb[44].mxu0 }
 0x3b8   :  { %v1943_v39 = vpop.f32.mrb[45].mxu0 }
 0x3b9   :  { %v1944_v28 = vadd.f32 %v1943_v39, %v1942_v37  ;;  %v1945_v4 = vpop.f32.mrb[46].mxu0 }
 0x3ba   :  { %v1946_v46 = vpop.f32.mrb[47].mxu0 }
 0x3bb   :  { %v1676_v54 = vadd.f32 %v1944_v28, %v2897_v44  ;;  %v1947_v15 = vadd.f32 %v1946_v46, %v1945_v4 }
 0x3bd   :  { %v1758_v38 = vmax.f32 %v1756_v34, %v1676_v54  ;;  %v1679_v51 = vadd.f32 %v1947_v15, %v2897_v44 }
 0x3bf   :  { %v1759_v55 = vmax.f32 %v1757_v35, %v1679_v51 }
 0x3c1   :  { %v2915_v42 = vmax.f32 %v1758_v38, %v1759_v55 }
 0x3d4   :  { %v1948_v24 = vpop.f32.mrb[48].mxu0 }
 0x3d5   :  { %v1949_v19 = vpop.f32.mrb[49].mxu0 }
 0x3d6   :  { %v1950_v52 = vadd.f32 %v1949_v19, %v1948_v24  ;;  %v1951_v58 = vpop.f32.mrb[50].mxu0 }
 0x3d7   :  { %v1952_v30 = vpop.f32.mrb[51].mxu0 }
 0x3d8   :  { %v1953_v25 = vadd.f32 %v1952_v30, %v1951_v58  ;;  %v1684_v53 = vadd.f32 %v1950_v52, %v2897_v44 }
 0x3da   :  { %v1687_v62 = vadd.f32 %v1953_v25, %v2897_v44 }
 0x3dc   :  { %v1954_v50 = vpop.f32.mrb[52].mxu0 }
 0x3dd   :  { %v1955_v60 = vpop.f32.mrb[53].mxu0 }
 0x3de   :  { %v1956_v61 = vadd.f32 %v1955_v60, %v1954_v50  ;;  %v1957_v63 = vpop.f32.mrb[54].mxu0 }
 0x3df   :  { %v1958_v1 = vpop.f32.mrb[55].mxu0 }
 0x3e0   :  { %v1692_v27 = vadd.f32 %v1956_v61, %v2897_v44  ;;  %v1959_v2 = vadd.f32 %v1958_v1, %v1957_v63  ;;  %v1761_v61 = vrot.slane %v2915_v42, 4 }
 0x3e2   :  { %v1767_v48 = vmax.f32 %v1684_v53, %v1692_v27  ;;  %v1695_v57 = vadd.f32 %v1959_v2, %v2897_v44 }
 0x3e4   :  { %v1768_v41 = vmax.f32 %v1687_v62, %v1695_v57  ;;  %v1762_v62 = vmax.f32 %v2915_v42, %v1761_v61 }
 0x3f5   :  { %v1960_v45 = vpop.f32.mrb[56].mxu0 }
 0x3f6   :  { %v1961_v36 = vpop.f32.mrb[57].mxu0 }
 0x3f7   :  { %v1962_v9 = vadd.f32 %v1961_v36, %v1960_v45  ;;  %v1963_v47 = vpop.f32.mrb[58].mxu0  ;;  %v1763_v45 = vrot.slane %v1762_v62, 2 }
 0x3f8   :  { %v1964_v32 = vpop.f32.mrb[59].mxu0 }
 0x3f9   :  { %v1700_v3 = vadd.f32 %v1962_v9, %v2897_v44  ;;  %v1965_v31 = vadd.f32 %v1964_v32, %v1963_v47  ;;  %v1764_v32 = vmax.f32 %v1762_v62, %v1763_v45 }
 0x3fb   :  { %v1769_v6 = vmax.f32 %v1767_v48, %v1700_v3  ;;  %v1703_v49 = vadd.f32 %v1965_v31, %v2897_v44  ;;  %v1765_v31 = vrot.slane %v1764_v32, 1 }
 0x3fd   :  { %v1770_v8 = vmax.f32 %v1768_v41, %v1703_v49  ;;  %v1966_v5 = vpop.f32.mrb[60].mxu0 }
 0x3fe   :  { %v1967_v7 = vpop.f32.mrb[61].mxu0 }
 0x3ff   :  { %v1968_v10 = vadd.f32 %v1967_v7, %v1966_v5  ;;  %v1969_v29 = vpop.f32.mrb[62].mxu0 }
 0x400   :  { %v1970_v11 = vpop.f32.mrb[63].mxu0 }
 0x401   :  { %v1708_v56 = vadd.f32 %v1968_v10, %v2897_v44  ;;  %v1971_v12 = vadd.f32 %v1970_v11, %v1969_v29 }
 0x403   :  { %v1771_v13 = vmax.f32 %v1769_v6, %v1708_v56  ;;  %v1711_v40 = vadd.f32 %v1971_v12, %v2897_v44 }
 0x405   :  { %v1772_v14 = vmax.f32 %v1770_v8, %v1711_v40  ;;  %v1766_v8 = vmax.f32 %v1764_v32, %v1765_v31 }
 0x41a   :  { %v1972_v43 = vpop.f32.mrb[64].mxu0 }
 0x41b   :  { %v1973_v17 = vpop.f32.mrb[65].mxu0 }
 0x41c   :  { %v1974_v18 = vadd.f32 %v1973_v17, %v1972_v43  ;;  %v1975_v21 = vpop.f32.mrb[66].mxu0 }
 0x41d   :  { %v1976_v20 = vpop.f32.mrb[67].mxu0 }
 0x41e   :  { %v1716_v22 = vadd.f32 %v1974_v18, %v2897_v44  ;;  %v1977_v23 = vadd.f32 %v1976_v20, %v1975_v21 }
 0x420   :  { %v1773_v26 = vmax.f32 %v1771_v13, %v1716_v22  ;;  %v1719_v33 = vadd.f32 %v1977_v23, %v2897_v44 }
 0x422   :  { %v1774_v0 = vmax.f32 %v1772_v14, %v1719_v33  ;;  %v1978_v59 = vpop.f32.mrb[68].mxu0 }
 0x423   :  { %v1979_v34 = vpop.f32.mrb[69].mxu0 }
 0x424   :  { %v1980_v16 = vadd.f32 %v1979_v34, %v1978_v59  ;;  %v1981_v35 = vpop.f32.mrb[70].mxu0 }
 0x425   :  { %v1982_v37 = vpop.f32.mrb[71].mxu0 }
 0x426   :  { %v1724_v39 = vadd.f32 %v1980_v16, %v2897_v44  ;;  %v1983_v28 = vadd.f32 %v1982_v37, %v1981_v35 }
 0x428   :  { %v1775_v4 = vmax.f32 %v1773_v26, %v1724_v39  ;;  %v1727_v46 = vadd.f32 %v1983_v28, %v2897_v44 }
 0x42a   :  { %v1776_v54 = vmax.f32 %v1774_v0, %v1727_v46 }
 0x43b   :  { %v1984_v15 = vpop.f32.mrb[72].mxu0 }
 0x43c   :  { %v1985_v38 = vpop.f32.mrb[73].mxu0 }
 0x43d   :  { %v1986_v51 = vadd.f32 %v1985_v38, %v1984_v15  ;;  %v1987_v55 = vpop.f32.mrb[74].mxu0 }
 0x43e   :  { %v1988_v24 = vpop.f32.mrb[75].mxu0 }
 0x43f   :  { %v1732_v19 = vadd.f32 %v1986_v51, %v2897_v44  ;;  %v1989_v52 = vadd.f32 %v1988_v24, %v1987_v55 }
 0x441   :  { %v1777_v58 = vmax.f32 %v1775_v4, %v1732_v19  ;;  %v1735_v30 = vadd.f32 %v1989_v52, %v2897_v44 }
 0x443   :  { %v1778_v25 = vmax.f32 %v1776_v54, %v1735_v30  ;;  %v1990_v50 = vpop.f32.mrb[76].mxu0 }
 0x444   :  { %v1991_v60 = vpop.f32.mrb[77].mxu0 }
 0x445   :  { %v1992_v63 = vadd.f32 %v1991_v60, %v1990_v50  ;;  %v1993_v1 = vpop.f32.mrb[78].mxu0 }
 0x446   :  { %v1994_v53 = vpop.f32.mrb[79].mxu0 }
 0x447   :  { %v1740_v27 = vadd.f32 %v1992_v63, %v2897_v44  ;;  %v1995_v2 = vadd.f32 %v1994_v53, %v1993_v1 }
 0x449   :  { %v1779_v48 = vmax.f32 %v1777_v58, %v1740_v27  ;;  %v1743_v57 = vadd.f32 %v1995_v2, %v2897_v44 }
 0x44b   :  { %v1780_v41 = vmax.f32 %v1778_v25, %v1743_v57 }
 0x44d   :  { %v1781_v36 = vmax.f32 %v1779_v48, %v1780_v41 }
 0x44f   :  { %v1782_v9 = vrot.slane %v1781_v36, 4 }
 0x451   :  { %v1783_v47 = vmax.f32 %v1781_v36, %v1782_v9 }
 0x453   :  { %v1784_v3 = vrot.slane %v1783_v47, 2 }
 0x455   :  { %v1785_v6 = vmax.f32 %v1783_v47, %v1784_v3 }
 0x457   :  { %v1786_v49 = vrot.slane %v1785_v6, 1 }
 0x459   :  { %v1787_v5 = vmax.f32 %v1785_v6, %v1786_v49 }
 0x45b   :  { %v1791_v42 = vsel %vm1790_vm1, %v1787_v5, %v1766_v8 }
 0x45c   :  { %1793 = vst [vmem:[#allocation5] sm:$0x3] %v1791_v42 }
 0x45d   :  { %2175 = shalt.err (!%p2172_p12)
}
 0x45e   :  { %s2176_s17 = scalar_lea.hbm %s2956_s9, 32 }
 0x45f   :  { %p2177_p13 = scmp.ne.s32.totalorder %s2956_s9, %s2176_s17  ;;  %p2180_p0 = scmp.lt.u32.totalorder %s2176_s17, %s2956_s9 }
 0x461   :  { %p2182_p1 = pnand %p2180_p0, %p2177_p13 }
 0x463   :  { %2185 = shalt.err (!%p2182_p1)
}
 0x464   :  { %1803 = dma.vmem_to_hbm [thread:$0]  %s1801_s14, 32, %s2956_s9, [#allocation4]  }
 0x465   :  { %2188 = dma.done.wait [#allocation4], 32  }
 0x466   :  { %2189 = vsyncadd [#allocation4], 4294967264 }
 0x467   :  { %1807 = vsyncpa [#allocation3], 1 }
 0x468   :  { %1808 = vsyncpa [#allocation4], 1 }

</bundles_post_ra>
